<compile_context>
chip_gen: v7x
topology: tpu7x:2x2x1
jax: 0.10.0
libtpu: 0.0.40
codegen_flags: <defaults>
</compile_context>

<pallas_src>
import functools

import jax
import jax.numpy as jnp
from jax.experimental import pallas as pl
from jax.experimental.pallas import tpu as pltpu

BIG = 1e9            # cross-batch / already-selected distance mask
NEG_BIG = -1e30      # padded-logit fill for the lane-dense head output
BN_EPS = 1e-5
OUT_PAD = 128        # lane-dense head output width


# ---------------------------------------------------------------------------
# small helpers
# ---------------------------------------------------------------------------
def _round8(c):
    return max(8, ((c + 7) // 8) * 8)


def _pad_cols(a):
    """Zero-pad the channel dim up to a multiple of 8 (min 8)."""
    n, c = a.shape
    cp = _round8(c)
    if cp == c:
        return a
    return jnp.pad(a, ((0, 0), (0, cp - c)))


def _pick_tile(n, cap=256):
    """Largest multiple-of-8 divisor of n, capped for v7x VMEM (64 MiB)."""
    cap = min(cap, max(8, n // 2))
    start = (cap // 8) * 8
    for t in range(start, 7, -8):
        if n % t == 0:
            return t
    return n


def _full2d(a):
    return pl.BlockSpec(a.shape, lambda i: (0, 0))


# ---------------------------------------------------------------------------
# Kernel 1: fused DynamicEdgeConv layer
#   - pairwise squared distances (row tile vs all nodes) with cross-batch mask
#   - kNN via k masked row-argmin passes (self included, as torch_cluster.knn)
#   - message = Lin2(ReLU(BN_eval(x_i @ W1a + (x_j - x_i) @ W1b + b1)))
#     with the x_i term hoisted and the BN scale pre-folded into the weights
#   - streamed max aggregation over the k neighbor slots
# ---------------------------------------------------------------------------
def _edgeconv_fused_kernel(xr_ref, xf_ref, br_ref, bf_ref,
                           wd_ref, wb_ref, b1_ref, w2_ref, b2_ref,
                           o_ref, *, k, n_total):
    xr = xr_ref[...]                                   # [T,  Cp] query rows
    xf = xf_ref[...]                                   # [N,  Cp] all nodes (resident)
    br = br_ref[...]                                   # [T,  1]
    bf = bf_ref[...]                                   # [N,  1]

    # pairwise squared distances + cross-graph mask
    sq_r = jnp.sum(xr * xr, axis=-1, keepdims=True)    # [T,1]
    sq_f = jnp.sum(xf * xf, axis=-1, keepdims=True)    # [N,1]
    d = (sq_r + sq_f.T
         - 2.0 * jnp.dot(xr, xf.T, preferred_element_type=jnp.float32))
    d = d + BIG * (br != bf.T).astype(jnp.float32)     # [T,N]

    # hoisted per-node linear terms (BN scale already folded in wd/wb/b1)
    base = jnp.dot(xr, wd_ref[...], preferred_element_type=jnp.float32) + b1_ref[...]
    xw = jnp.dot(xf, wb_ref[...], preferred_element_type=jnp.float32)   # [N,H]

    iota = jax.lax.broadcasted_iota(jnp.int32, d.shape, 1).astype(jnp.float32)
    w2 = w2_ref[...]
    b2 = b2_ref[...]
    n_f = jnp.float32(n_total)

    out = None
    for kk in range(k):                                # streamed top-k + max aggr
        mn = jnp.min(d, axis=-1, keepdims=True)        # nearest remaining
        idx = jnp.min(jnp.where(d <= mn, iota, n_f), axis=-1, keepdims=True)
        onehot = (iota == idx).astype(jnp.float32)     # [T,N] one-hot neighbor pick
        # "gather" x_j @ W1b via one-hot matmul (pure MXU work, no dynamic index)
        xwj = jnp.dot(onehot, xw, preferred_element_type=jnp.float32)   # [T,H]
        msg = jnp.dot(jnp.maximum(base + xwj, 0.0), w2,
                      preferred_element_type=jnp.float32) + b2
        out = msg if out is None else jnp.maximum(out, msg)
        d = d + BIG * onehot                           # exclude chosen column
    o_ref[...] = out


def dynamic_edge_conv(x, batchf, k, p, *, tile_n):
    n, cp = x.shape
    hidden = p["w2"].shape[1]
    kern = functools.partial(_edgeconv_fused_kernel, k=k, n_total=n)
    # TODO(synk): for very large N also tile the key/column axis of the
    # distance block; currently the full key set (N x Cp) is VMEM-resident.
    return pl.pallas_call(
        kern,
        out_shape=jax.ShapeDtypeStruct((n, hidden), jnp.float32),
        grid=(n // tile_n,),
        in_specs=[
            pl.BlockSpec((tile_n, cp), lambda i: (i, 0)),   # query rows
            pl.BlockSpec((n, cp), lambda i: (0, 0)),        # all nodes (resident)
            pl.BlockSpec((tile_n, 1), lambda i: (i, 0)),    # batch ids (rows)
            pl.BlockSpec((n, 1), lambda i: (0, 0)),         # batch ids (all)
            _full2d(p["wd"]), _full2d(p["wb"]), _full2d(p["b1"]),
            _full2d(p["w2"]), _full2d(p["b2"]),
        ],
        out_specs=pl.BlockSpec((tile_n, hidden), lambda i: (i, 0)),
        compiler_params=pltpu.CompilerParams(dimension_semantics=("parallel",)),
    )(x, x, batchf, batchf, p["wd"], p["wb"], p["b1"], p["w2"], p["b2"])


# ---------------------------------------------------------------------------
# Kernel 2: head MLP with the x1/x2/x3 concat fused (W1 split into 3 row
#           blocks), dropout = eval identity, log_softmax over the feature
#           dim, stored into a lane-dense 128-wide padded buffer.
# ---------------------------------------------------------------------------
def _head_kernel(x1_ref, x2_ref, x3_ref, w1a_ref, w1b_ref, w1c_ref, b1_ref,
                 w2_ref, b2_ref, w3_ref, b3_ref, w4_ref, b4_ref, o_ref):
    h = (jnp.dot(x1_ref[...], w1a_ref[...], preferred_element_type=jnp.float32)
         + jnp.dot(x2_ref[...], w1b_ref[...], preferred_element_type=jnp.float32)
         + jnp.dot(x3_ref[...], w1c_ref[...], preferred_element_type=jnp.float32)
         + b1_ref[...])
    h = jnp.maximum(h, 0.0)
    h = jnp.maximum(
        jnp.dot(h, w2_ref[...], preferred_element_type=jnp.float32) + b2_ref[...], 0.0)
    h = jnp.maximum(
        jnp.dot(h, w3_ref[...], preferred_element_type=jnp.float32) + b3_ref[...], 0.0)
    # padded logit columns carry a -1e30 bias -> exp underflows to 0 exactly
    logits = jnp.dot(h, w4_ref[...], preferred_element_type=jnp.float32) + b4_ref[...]
    m = jnp.max(logits, axis=-1, keepdims=True)
    z = logits - m
    lse = jnp.log(jnp.sum(jnp.exp(z), axis=-1, keepdims=True))
    o_ref[...] = z - lse


def head_mlp(x1, x2, x3, p, *, tile_n):
    n = x1.shape[0]
    out_pad = p["w4"].shape[1]

    def row(c):
        return pl.BlockSpec((tile_n, c), lambda i: (i, 0))

    return pl.pallas_call(
        _head_kernel,
        out_shape=jax.ShapeDtypeStruct((n, out_pad), jnp.float32),
        grid=(n // tile_n,),
        in_specs=[row(x1.shape[1]), row(x2.shape[1]), row(x3.shape[1]),
                  _full2d(p["w1a"]), _full2d(p["w1b"]), _full2d(p["w1c"]),
                  _full2d(p["b1"]),
                  _full2d(p["w2"]), _full2d(p["b2"]),
                  _full2d(p["w3"]), _full2d(p["b3"]),
                  _full2d(p["w4"]), _full2d(p["b4"])],
        out_specs=pl.BlockSpec((tile_n, out_pad), lambda i: (i, 0)),
        compiler_params=pltpu.CompilerParams(dimension_semantics=("parallel",)),
    )(x1, x2, x3, p["w1a"], p["w1b"], p["w1c"], p["b1"],
      p["w2"], p["b2"], p["w3"], p["b3"], p["w4"], p["b4"])


# ---------------------------------------------------------------------------
# Forward pass
# ---------------------------------------------------------------------------
def dgcnn_forward(x, batchf, params, *, k, out_ch):
    n = x.shape[0]
    tile_n = _pick_tile(n)
    x1 = dynamic_edge_conv(_pad_cols(x),  batchf, k, params["conv1"], tile_n=tile_n)
    x2 = dynamic_edge_conv(_pad_cols(x1), batchf, k, params["conv2"], tile_n=tile_n)
    x3 = dynamic_edge_conv(_pad_cols(x2), batchf, k, params["conv3"], tile_n=tile_n)
    out_p = head_mlp(x1, x2, x3, params["head"], tile_n=tile_n)
    return out_p[:, :out_ch]                     # strip the lane-padding columns


# ---------------------------------------------------------------------------
# Deterministic parameter init (mimics torch Linear default init) + kernel-ready
# prep: BN folding, x_i-hoist split, channel padding, head concat split,
# lane-dense logit padding.
# ---------------------------------------------------------------------------
def _linear_init(key, fan_in, fan_out):
    kw, kb = jax.random.split(key)
    bound = 1.0 / float(fan_in) ** 0.5
    w = jax.random.uniform(kw, (fan_in, fan_out), jnp.float32, -bound, bound)
    b = jax.random.uniform(kb, (1, fan_out), jnp.float32, -bound, bound)
    return w, b


def _edgeconv_params(key, in_ch, hidden):
    k1, k2 = jax.random.split(key)
    w1, b1 = _linear_init(k1, 2 * in_ch, hidden)     # Lin(2C -> H)
    w2, b2 = _linear_init(k2, hidden, hidden)        # Lin(H -> H)
    w1a, w1b = w1[:in_ch], w1[in_ch:]
    # BatchNorm1d (PyG MLP default), eval mode, fresh stats -> scale only.
    s = 1.0 / float(jnp.sqrt(1.0 + BN_EPS))
    cp = _round8(in_ch)
    wd = jnp.zeros((cp, hidden), jnp.float32).at[:in_ch].set((w1a - w1b) * s)
    wb = jnp.zeros((cp, hidden), jnp.float32).at[:in_ch].set(w1b * s)
    return dict(wd=wd, wb=wb, b1=b1 * s, w2=w2, b2=b2)


def _head_params(keys, conv_dims, mlp_dims):
    c1, c2, c3 = conv_dims
    dims = [c1 + c2 + c3] + list(mlp_dims)           # [in, m1, m2, m3, out_ch]
    w1, b1 = _linear_init(keys[0], dims[0], dims[1])
    w2, b2 = _linear_init(keys[1], dims[1], dims[2])
    w3, b3 = _linear_init(keys[2], dims[2], dims[3])
    w4, b4 = _linear_init(keys[3], dims[3], dims[4])
    out_ch = dims[4]
    w4p = jnp.zeros((dims[3], OUT_PAD), jnp.float32).at[:, :out_ch].set(w4)
    b4p = jnp.full((1, OUT_PAD), NEG_BIG, jnp.float32).at[:, :out_ch].set(b4)
    return dict(w1a=w1[:c1], w1b=w1[c1:c1 + c2], w1c=w1[c1 + c2:], b1=b1,
                w2=w2, b2=b2, w3=w3, b3=b3, w4=w4p, b4=b4p)


def init_params(key, cfg):
    keys = jax.random.split(key, 7)
    return {
        "conv1": _edgeconv_params(keys[0], 1,              cfg["n_conv1"]),
        "conv2": _edgeconv_params(keys[1], cfg["n_conv1"], cfg["n_conv2"]),
        "conv3": _edgeconv_params(keys[2], cfg["n_conv2"], cfg["n_conv3"]),
        "head": _head_params(keys[3:7],
                             (cfg["n_conv1"], cfg["n_conv2"], cfg["n_conv3"]),
                             [cfg["n_mlp1"], cfg["n_mlp2"], cfg["n_mlp3"],
                              cfg["out_channels"]]),
    }


if __name__ == "__main__":
    cfg = dict(n_conv1=32, n_conv2=32, n_conv3=32,
               n_mlp1=64, n_mlp2=64, n_mlp3=32,
               out_channels=4, k=4, aggr="max", mlp_dropout=0.0)

    key = jax.random.PRNGKey(0)
    kx, kp = jax.random.split(key)

    n_nodes = 16                                     # two graphs of 8 nodes each
    x = jax.random.normal(kx, (n_nodes, 1), dtype=jnp.float32)        # data.x
    batch = jnp.repeat(jnp.arange(2, dtype=jnp.int32), n_nodes // 2)  # data.batch
    batchf = batch.reshape(n_nodes, 1).astype(jnp.float32)

    params = init_params(kp, cfg)

    fwd = jax.jit(functools.partial(dgcnn_forward, k=cfg["k"],
                                    out_ch=cfg["out_channels"]))
    out = jax.block_until_ready(fwd(x, batchf, params))

    assert out.shape == (n_nodes, cfg["out_channels"])
    assert bool(jnp.all(jnp.isfinite(out)))
    # log_softmax rows must exponentiate-sum to 1
    assert bool(jnp.allclose(jnp.sum(jnp.exp(out), axis=1), 1.0, atol=1e-4))
    print("KERNEL_OK")
</pallas_src>

<mosaic_0001>
module attributes {stable_mosaic.version = 11 : i64} {
  func.func @_edgeconv_fused_kernel(%arg0: i32, %arg1: memref<8x8xf32, #tpu.memory_space<vmem>>, %arg2: memref<16x8xf32, #tpu.memory_space<vmem>>, %arg3: memref<8x1xf32, #tpu.memory_space<vmem>>, %arg4: memref<16x1xf32, #tpu.memory_space<vmem>>, %arg5: memref<8x32xf32, #tpu.memory_space<vmem>>, %arg6: memref<8x32xf32, #tpu.memory_space<vmem>>, %arg7: memref<1x32xf32, #tpu.memory_space<vmem>>, %arg8: memref<32x32xf32, #tpu.memory_space<vmem>>, %arg9: memref<1x32xf32, #tpu.memory_space<vmem>>, %arg10: memref<8x32xf32, #tpu.memory_space<vmem>>) attributes {dimension_semantics = [#tpu.dimension_semantics<parallel>], iteration_bounds = array<i64: 2>, scalar_prefetch = 0 : i64, scratch_operands = 0 : i64, tpu.core_type = #tpu.core_type<tc>, window_params = [{transform_indices = @transform_0, window_bounds = array<i64: 8, 8>}, {pipeline_mode = #tpu.pipeline_mode<synchronous>, transform_indices = @transform_1, window_bounds = array<i64: 16, 8>}, {transform_indices = @transform_2, window_bounds = array<i64: 8, 1>}, {pipeline_mode = #tpu.pipeline_mode<synchronous>, transform_indices = @transform_3, window_bounds = array<i64: 16, 1>}, {pipeline_mode = #tpu.pipeline_mode<synchronous>, transform_indices = @transform_4, window_bounds = array<i64: 8, 32>}, {pipeline_mode = #tpu.pipeline_mode<synchronous>, transform_indices = @transform_5, window_bounds = array<i64: 8, 32>}, {pipeline_mode = #tpu.pipeline_mode<synchronous>, transform_indices = @transform_6, window_bounds = array<i64: 1, 32>}, {pipeline_mode = #tpu.pipeline_mode<synchronous>, transform_indices = @transform_7, window_bounds = array<i64: 32, 32>}, {pipeline_mode = #tpu.pipeline_mode<synchronous>, transform_indices = @transform_8, window_bounds = array<i64: 1, 32>}, {transform_indices = @transform_9, window_bounds = array<i64: 8, 32>}]} {
    %c0 = arith.constant 0 : index
    %c0_0 = arith.constant 0 : index
    %0 = vector.load %arg1[%c0, %c0_0] : memref<8x8xf32, #tpu.memory_space<vmem>>, vector<8x8xf32>
    %c0_1 = arith.constant 0 : index
    %c0_2 = arith.constant 0 : index
    %1 = vector.load %arg2[%c0_1, %c0_2] : memref<16x8xf32, #tpu.memory_space<vmem>>, vector<16x8xf32>
    %c0_3 = arith.constant 0 : index
    %c0_4 = arith.constant 0 : index
    %2 = vector.load %arg3[%c0_3, %c0_4] : memref<8x1xf32, #tpu.memory_space<vmem>>, vector<8x1xf32>
    %c0_5 = arith.constant 0 : index
    %c0_6 = arith.constant 0 : index
    %3 = vector.load %arg4[%c0_5, %c0_6] : memref<16x1xf32, #tpu.memory_space<vmem>>, vector<16x1xf32>
    %4 = arith.mulf %0, %0 : vector<8x8xf32>
    %cst = arith.constant dense<0.000000e+00> : vector<8xf32>
    %5 = vector.multi_reduction <add>, %4, %cst [1] : vector<8x8xf32> to vector<8xf32>
    %6 = vector.shape_cast %5 : vector<8xf32> to vector<8x1xf32>
    %7 = arith.mulf %1, %1 : vector<16x8xf32>
    %cst_7 = arith.constant dense<0.000000e+00> : vector<16xf32>
    %8 = vector.multi_reduction <add>, %7, %cst_7 [1] : vector<16x8xf32> to vector<16xf32>
    %9 = vector.shape_cast %8 : vector<16xf32> to vector<16x1xf32>
    %10 = tpu.transpose %9, [1, 0] : vector<16x1xf32> -> vector<1x16xf32>
    %11 = vector.broadcast %6 : vector<8x1xf32> to vector<8x16xf32>
    %12 = vector.broadcast %10 : vector<1x16xf32> to vector<8x16xf32>
    %13 = arith.addf %11, %12 : vector<8x16xf32>
    %14 = tpu.transpose %1, [1, 0] : vector<16x8xf32> -> vector<8x16xf32>
    %cst_8 = arith.constant dense<0.000000e+00> : vector<8x16xf32>
    %15 = tpu.matmul %0, %14, %cst_8 {dimension_numbers = #tpu.dot_dimension_numbers<[1], [0], [0], [1], [0, 0, 1, 1], [], []>} : vector<8x8xf32>, vector<8x16xf32>, vector<8x16xf32> -> vector<8x16xf32>
    %cst_9 = arith.constant 2.000000e+00 : f32
    %16 = vector.broadcast %cst_9 : f32 to vector<8x16xf32>
    %17 = arith.mulf %16, %15 : vector<8x16xf32>
    %18 = arith.subf %13, %17 : vector<8x16xf32>
    %19 = tpu.transpose %3, [1, 0] : vector<16x1xf32> -> vector<1x16xf32>
    %20 = vector.broadcast %2 : vector<8x1xf32> to vector<8x16xf32>
    %21 = vector.broadcast %19 : vector<1x16xf32> to vector<8x16xf32>
    %22 = arith.cmpf one, %20, %21 : vector<8x16xf32>
    %23 = arith.extui %22 : vector<8x16xi1> to vector<8x16xi32>
    %24 = arith.sitofp %23 : vector<8x16xi32> to vector<8x16xf32>
    %cst_10 = arith.constant 1.000000e+09 : f32
    %25 = vector.broadcast %cst_10 : f32 to vector<8x16xf32>
    %26 = arith.mulf %25, %24 : vector<8x16xf32>
    %27 = arith.addf %18, %26 : vector<8x16xf32>
    %c0_11 = arith.constant 0 : index
    %c0_12 = arith.constant 0 : index
    %28 = vector.load %arg5[%c0_11, %c0_12] : memref<8x32xf32, #tpu.memory_space<vmem>>, vector<8x32xf32>
    %cst_13 = arith.constant dense<0.000000e+00> : vector<8x32xf32>
    %29 = tpu.matmul %0, %28, %cst_13 {dimension_numbers = #tpu.dot_dimension_numbers<[1], [0], [0], [1], [0, 0, 1, 1], [], []>} : vector<8x8xf32>, vector<8x32xf32>, vector<8x32xf32> -> vector<8x32xf32>
    %c0_14 = arith.constant 0 : index
    %c0_15 = arith.constant 0 : index
    %30 = vector.load %arg7[%c0_14, %c0_15] : memref<1x32xf32, #tpu.memory_space<vmem>>, vector<1x32xf32>
    %31 = vector.broadcast %30 : vector<1x32xf32> to vector<8x32xf32>
    %32 = arith.addf %29, %31 : vector<8x32xf32>
    %c0_16 = arith.constant 0 : index
    %c0_17 = arith.constant 0 : index
    %33 = vector.load %arg6[%c0_16, %c0_17] : memref<8x32xf32, #tpu.memory_space<vmem>>, vector<8x32xf32>
    %cst_18 = arith.constant dense<0.000000e+00> : vector<16x32xf32>
    %34 = tpu.matmul %1, %33, %cst_18 {dimension_numbers = #tpu.dot_dimension_numbers<[1], [0], [0], [1], [0, 0, 1, 1], [], []>} : vector<16x8xf32>, vector<8x32xf32>, vector<16x32xf32> -> vector<16x32xf32>
    %35 = tpu.iota {dimensions = array<i32: 1>} : vector<8x16xi32>
    %36 = arith.sitofp %35 : vector<8x16xi32> to vector<8x16xf32>
    %c0_19 = arith.constant 0 : index
    %c0_20 = arith.constant 0 : index
    %37 = vector.load %arg8[%c0_19, %c0_20] : memref<32x32xf32, #tpu.memory_space<vmem>>, vector<32x32xf32>
    %c0_21 = arith.constant 0 : index
    %c0_22 = arith.constant 0 : index
    %38 = vector.load %arg9[%c0_21, %c0_22] : memref<1x32xf32, #tpu.memory_space<vmem>>, vector<1x32xf32>
    %cst_23 = arith.constant dense<0x7F800000> : vector<8xf32>
    %39 = vector.multi_reduction <minimumf>, %27, %cst_23 [1] : vector<8x16xf32> to vector<8xf32>
    %40 = vector.shape_cast %39 : vector<8xf32> to vector<8x1xf32>
    %41 = vector.broadcast %40 : vector<8x1xf32> to vector<8x16xf32>
    %42 = arith.cmpf ole, %27, %41 : vector<8x16xf32>
    %cst_24 = arith.constant 1.600000e+01 : f32
    %43 = vector.broadcast %cst_24 : f32 to vector<8x16xf32>
    %44 = arith.select %42, %36, %43 : vector<8x16xi1>, vector<8x16xf32>
    %cst_25 = arith.constant dense<0x7F800000> : vector<8xf32>
    %45 = vector.multi_reduction <minimumf>, %44, %cst_25 [1] : vector<8x16xf32> to vector<8xf32>
    %46 = vector.shape_cast %45 : vector<8xf32> to vector<8x1xf32>
    %47 = vector.broadcast %46 : vector<8x1xf32> to vector<8x16xf32>
    %48 = arith.cmpf oeq, %36, %47 : vector<8x16xf32>
    %49 = arith.extui %48 : vector<8x16xi1> to vector<8x16xi32>
    %50 = arith.sitofp %49 : vector<8x16xi32> to vector<8x16xf32>
    %cst_26 = arith.constant dense<0.000000e+00> : vector<8x32xf32>
    %51 = tpu.matmul %50, %34, %cst_26 {dimension_numbers = #tpu.dot_dimension_numbers<[1], [0], [0], [1], [0, 0, 1, 1], [], []>} : vector<8x16xf32>, vector<16x32xf32>, vector<8x32xf32> -> vector<8x32xf32>
    %52 = arith.addf %32, %51 : vector<8x32xf32>
    %cst_27 = arith.constant 0.000000e+00 : f32
    %53 = vector.broadcast %cst_27 : f32 to vector<8x32xf32>
    %54 = arith.maximumf %52, %53 : vector<8x32xf32>
    %cst_28 = arith.constant dense<0.000000e+00> : vector<8x32xf32>
    %55 = tpu.matmul %54, %37, %cst_28 {dimension_numbers = #tpu.dot_dimension_numbers<[1], [0], [0], [1], [0, 0, 1, 1], [], []>} : vector<8x32xf32>, vector<32x32xf32>, vector<8x32xf32> -> vector<8x32xf32>
    %56 = vector.broadcast %38 : vector<1x32xf32> to vector<8x32xf32>
    %57 = arith.addf %55, %56 : vector<8x32xf32>
    %cst_29 = arith.constant 1.000000e+09 : f32
    %58 = vector.broadcast %cst_29 : f32 to vector<8x16xf32>
    %59 = arith.mulf %58, %50 : vector<8x16xf32>
    %60 = arith.addf %27, %59 : vector<8x16xf32>
    %cst_30 = arith.constant dense<0x7F800000> : vector<8xf32>
    %61 = vector.multi_reduction <minimumf>, %60, %cst_30 [1] : vector<8x16xf32> to vector<8xf32>
    %62 = vector.shape_cast %61 : vector<8xf32> to vector<8x1xf32>
    %63 = vector.broadcast %62 : vector<8x1xf32> to vector<8x16xf32>
    %64 = arith.cmpf ole, %60, %63 : vector<8x16xf32>
    %cst_31 = arith.constant 1.600000e+01 : f32
    %65 = vector.broadcast %cst_31 : f32 to vector<8x16xf32>
    %66 = arith.select %64, %36, %65 : vector<8x16xi1>, vector<8x16xf32>
    %cst_32 = arith.constant dense<0x7F800000> : vector<8xf32>
    %67 = vector.multi_reduction <minimumf>, %66, %cst_32 [1] : vector<8x16xf32> to vector<8xf32>
    %68 = vector.shape_cast %67 : vector<8xf32> to vector<8x1xf32>
    %69 = vector.broadcast %68 : vector<8x1xf32> to vector<8x16xf32>
    %70 = arith.cmpf oeq, %36, %69 : vector<8x16xf32>
    %71 = arith.extui %70 : vector<8x16xi1> to vector<8x16xi32>
    %72 = arith.sitofp %71 : vector<8x16xi32> to vector<8x16xf32>
    %cst_33 = arith.constant dense<0.000000e+00> : vector<8x32xf32>
    %73 = tpu.matmul %72, %34, %cst_33 {dimension_numbers = #tpu.dot_dimension_numbers<[1], [0], [0], [1], [0, 0, 1, 1], [], []>} : vector<8x16xf32>, vector<16x32xf32>, vector<8x32xf32> -> vector<8x32xf32>
    %74 = arith.addf %32, %73 : vector<8x32xf32>
    %cst_34 = arith.constant 0.000000e+00 : f32
    %75 = vector.broadcast %cst_34 : f32 to vector<8x32xf32>
    %76 = arith.maximumf %74, %75 : vector<8x32xf32>
    %cst_35 = arith.constant dense<0.000000e+00> : vector<8x32xf32>
    %77 = tpu.matmul %76, %37, %cst_35 {dimension_numbers = #tpu.dot_dimension_numbers<[1], [0], [0], [1], [0, 0, 1, 1], [], []>} : vector<8x32xf32>, vector<32x32xf32>, vector<8x32xf32> -> vector<8x32xf32>
    %78 = vector.broadcast %38 : vector<1x32xf32> to vector<8x32xf32>
    %79 = arith.addf %77, %78 : vector<8x32xf32>
    %80 = arith.maximumf %57, %79 : vector<8x32xf32>
    %cst_36 = arith.constant 1.000000e+09 : f32
    %81 = vector.broadcast %cst_36 : f32 to vector<8x16xf32>
    %82 = arith.mulf %81, %72 : vector<8x16xf32>
    %83 = arith.addf %60, %82 : vector<8x16xf32>
    %cst_37 = arith.constant dense<0x7F800000> : vector<8xf32>
    %84 = vector.multi_reduction <minimumf>, %83, %cst_37 [1] : vector<8x16xf32> to vector<8xf32>
    %85 = vector.shape_cast %84 : vector<8xf32> to vector<8x1xf32>
    %86 = vector.broadcast %85 : vector<8x1xf32> to vector<8x16xf32>
    %87 = arith.cmpf ole, %83, %86 : vector<8x16xf32>
    %cst_38 = arith.constant 1.600000e+01 : f32
    %88 = vector.broadcast %cst_38 : f32 to vector<8x16xf32>
    %89 = arith.select %87, %36, %88 : vector<8x16xi1>, vector<8x16xf32>
    %cst_39 = arith.constant dense<0x7F800000> : vector<8xf32>
    %90 = vector.multi_reduction <minimumf>, %89, %cst_39 [1] : vector<8x16xf32> to vector<8xf32>
    %91 = vector.shape_cast %90 : vector<8xf32> to vector<8x1xf32>
    %92 = vector.broadcast %91 : vector<8x1xf32> to vector<8x16xf32>
    %93 = arith.cmpf oeq, %36, %92 : vector<8x16xf32>
    %94 = arith.extui %93 : vector<8x16xi1> to vector<8x16xi32>
    %95 = arith.sitofp %94 : vector<8x16xi32> to vector<8x16xf32>
    %cst_40 = arith.constant dense<0.000000e+00> : vector<8x32xf32>
    %96 = tpu.matmul %95, %34, %cst_40 {dimension_numbers = #tpu.dot_dimension_numbers<[1], [0], [0], [1], [0, 0, 1, 1], [], []>} : vector<8x16xf32>, vector<16x32xf32>, vector<8x32xf32> -> vector<8x32xf32>
    %97 = arith.addf %32, %96 : vector<8x32xf32>
    %cst_41 = arith.constant 0.000000e+00 : f32
    %98 = vector.broadcast %cst_41 : f32 to vector<8x32xf32>
    %99 = arith.maximumf %97, %98 : vector<8x32xf32>
    %cst_42 = arith.constant dense<0.000000e+00> : vector<8x32xf32>
    %100 = tpu.matmul %99, %37, %cst_42 {dimension_numbers = #tpu.dot_dimension_numbers<[1], [0], [0], [1], [0, 0, 1, 1], [], []>} : vector<8x32xf32>, vector<32x32xf32>, vector<8x32xf32> -> vector<8x32xf32>
    %101 = vector.broadcast %38 : vector<1x32xf32> to vector<8x32xf32>
    %102 = arith.addf %100, %101 : vector<8x32xf32>
    %103 = arith.maximumf %80, %102 : vector<8x32xf32>
    %cst_43 = arith.constant 1.000000e+09 : f32
    %104 = vector.broadcast %cst_43 : f32 to vector<8x16xf32>
    %105 = arith.mulf %104, %95 : vector<8x16xf32>
    %106 = arith.addf %83, %105 : vector<8x16xf32>
    %cst_44 = arith.constant dense<0x7F800000> : vector<8xf32>
    %107 = vector.multi_reduction <minimumf>, %106, %cst_44 [1] : vector<8x16xf32> to vector<8xf32>
    %108 = vector.shape_cast %107 : vector<8xf32> to vector<8x1xf32>
    %109 = vector.broadcast %108 : vector<8x1xf32> to vector<8x16xf32>
    %110 = arith.cmpf ole, %106, %109 : vector<8x16xf32>
    %cst_45 = arith.constant 1.600000e+01 : f32
    %111 = vector.broadcast %cst_45 : f32 to vector<8x16xf32>
    %112 = arith.select %110, %36, %111 : vector<8x16xi1>, vector<8x16xf32>
    %cst_46 = arith.constant dense<0x7F800000> : vector<8xf32>
    %113 = vector.multi_reduction <minimumf>, %112, %cst_46 [1] : vector<8x16xf32> to vector<8xf32>
    %114 = vector.shape_cast %113 : vector<8xf32> to vector<8x1xf32>
    %115 = vector.broadcast %114 : vector<8x1xf32> to vector<8x16xf32>
    %116 = arith.cmpf oeq, %36, %115 : vector<8x16xf32>
    %117 = arith.extui %116 : vector<8x16xi1> to vector<8x16xi32>
    %118 = arith.sitofp %117 : vector<8x16xi32> to vector<8x16xf32>
    %cst_47 = arith.constant dense<0.000000e+00> : vector<8x32xf32>
    %119 = tpu.matmul %118, %34, %cst_47 {dimension_numbers = #tpu.dot_dimension_numbers<[1], [0], [0], [1], [0, 0, 1, 1], [], []>} : vector<8x16xf32>, vector<16x32xf32>, vector<8x32xf32> -> vector<8x32xf32>
    %120 = arith.addf %32, %119 : vector<8x32xf32>
    %cst_48 = arith.constant 0.000000e+00 : f32
    %121 = vector.broadcast %cst_48 : f32 to vector<8x32xf32>
    %122 = arith.maximumf %120, %121 : vector<8x32xf32>
    %cst_49 = arith.constant dense<0.000000e+00> : vector<8x32xf32>
    %123 = tpu.matmul %122, %37, %cst_49 {dimension_numbers = #tpu.dot_dimension_numbers<[1], [0], [0], [1], [0, 0, 1, 1], [], []>} : vector<8x32xf32>, vector<32x32xf32>, vector<8x32xf32> -> vector<8x32xf32>
    %124 = vector.broadcast %38 : vector<1x32xf32> to vector<8x32xf32>
    %125 = arith.addf %123, %124 : vector<8x32xf32>
    %126 = arith.maximumf %103, %125 : vector<8x32xf32>
    %c0_50 = arith.constant 0 : index
    %c0_51 = arith.constant 0 : index
    %127 = vector.load %arg10[%c0_50, %c0_51] : memref<8x32xf32, #tpu.memory_space<vmem>>, vector<8x32xf32>
    tpu.vector_store %arg10[%c0_50, %c0_51], %126 {strides = array<i32>} : memref<8x32xf32, #tpu.memory_space<vmem>>, vector<8x32xf32>,
    return
  }
  func.func @transform_0(%arg0: i32) -> (i32, i32) {
    %c0_i32 = arith.constant 0 : i32
    %c0_i32_0 = arith.constant 0 : i32
    return %arg0, %c0_i32 : i32, i32
  }
  func.func @transform_1(%arg0: i32) -> (i32, i32) {
    %c0_i32 = arith.constant 0 : i32
    %c0_i32_0 = arith.constant 0 : i32
    %c0_i32_1 = arith.constant 0 : i32
    return %c0_i32, %c0_i32_0 : i32, i32
  }
  func.func @transform_2(%arg0: i32) -> (i32, i32) {
    %c0_i32 = arith.constant 0 : i32
    %c0_i32_0 = arith.constant 0 : i32
    return %arg0, %c0_i32 : i32, i32
  }
  func.func @transform_3(%arg0: i32) -> (i32, i32) {
    %c0_i32 = arith.constant 0 : i32
    %c0_i32_0 = arith.constant 0 : i32
    %c0_i32_1 = arith.constant 0 : i32
    return %c0_i32, %c0_i32_0 : i32, i32
  }
  func.func @transform_4(%arg0: i32) -> (i32, i32) {
    %c0_i32 = arith.constant 0 : i32
    %c0_i32_0 = arith.constant 0 : i32
    %c0_i32_1 = arith.constant 0 : i32
    return %c0_i32, %c0_i32_0 : i32, i32
  }
  func.func @transform_5(%arg0: i32) -> (i32, i32) {
    %c0_i32 = arith.constant 0 : i32
    %c0_i32_0 = arith.constant 0 : i32
    %c0_i32_1 = arith.constant 0 : i32
    return %c0_i32, %c0_i32_0 : i32, i32
  }
  func.func @transform_6(%arg0: i32) -> (i32, i32) {
    %c0_i32 = arith.constant 0 : i32
    %c0_i32_0 = arith.constant 0 : i32
    %c0_i32_1 = arith.constant 0 : i32
    return %c0_i32, %c0_i32_0 : i32, i32
  }
  func.func @transform_7(%arg0: i32) -> (i32, i32) {
    %c0_i32 = arith.constant 0 : i32
    %c0_i32_0 = arith.constant 0 : i32
    %c0_i32_1 = arith.constant 0 : i32
    return %c0_i32, %c0_i32_0 : i32, i32
  }
  func.func @transform_8(%arg0: i32) -> (i32, i32) {
    %c0_i32 = arith.constant 0 : i32
    %c0_i32_0 = arith.constant 0 : i32
    %c0_i32_1 = arith.constant 0 : i32
    return %c0_i32, %c0_i32_0 : i32, i32
  }
  func.func @transform_9(%arg0: i32) -> (i32, i32) {
    %c0_i32 = arith.constant 0 : i32
    %c0_i32_0 = arith.constant 0 : i32
    return %arg0, %c0_i32 : i32, i32
  }
}

module attributes {stable_mosaic.version = 11 : i64} {
  func.func @_head_kernel(%arg0: i32, %arg1: memref<8x32xf32, #tpu.memory_space<vmem>>, %arg2: memref<8x32xf32, #tpu.memory_space<vmem>>, %arg3: memref<8x32xf32, #tpu.memory_space<vmem>>, %arg4: memref<32x64xf32, #tpu.memory_space<vmem>>, %arg5: memref<32x64xf32, #tpu.memory_space<vmem>>, %arg6: memref<32x64xf32, #tpu.memory_space<vmem>>, %arg7: memref<1x64xf32, #tpu.memory_space<vmem>>, %arg8: memref<64x64xf32, #tpu.memory_space<vmem>>, %arg9: memref<1x64xf32, #tpu.memory_space<vmem>>, %arg10: memref<64x32xf32, #tpu.memory_space<vmem>>, %arg11: memref<1x32xf32, #tpu.memory_space<vmem>>, %arg12: memref<32x128xf32, #tpu.memory_space<vmem>>, %arg13: memref<1x128xf32, #tpu.memory_space<vmem>>, %arg14: memref<8x128xf32, #tpu.memory_space<vmem>>) attributes {dimension_semantics = [#tpu.dimension_semantics<parallel>], iteration_bounds = array<i64: 2>, scalar_prefetch = 0 : i64, scratch_operands = 0 : i64, tpu.core_type = #tpu.core_type<tc>, window_params = [{transform_indices = @transform_0, window_bounds = array<i64: 8, 32>}, {transform_indices = @transform_1, window_bounds = array<i64: 8, 32>}, {transform_indices = @transform_2, window_bounds = array<i64: 8, 32>}, {pipeline_mode = #tpu.pipeline_mode<synchronous>, transform_indices = @transform_3, window_bounds = array<i64: 32, 64>}, {pipeline_mode = #tpu.pipeline_mode<synchronous>, transform_indices = @transform_4, window_bounds = array<i64: 32, 64>}, {pipeline_mode = #tpu.pipeline_mode<synchronous>, transform_indices = @transform_5, window_bounds = array<i64: 32, 64>}, {pipeline_mode = #tpu.pipeline_mode<synchronous>, transform_indices = @transform_6, window_bounds = array<i64: 1, 64>}, {pipeline_mode = #tpu.pipeline_mode<synchronous>, transform_indices = @transform_7, window_bounds = array<i64: 64, 64>}, {pipeline_mode = #tpu.pipeline_mode<synchronous>, transform_indices = @transform_8, window_bounds = array<i64: 1, 64>}, {pipeline_mode = #tpu.pipeline_mode<synchronous>, transform_indices = @transform_9, window_bounds = array<i64: 64, 32>}, {pipeline_mode = #tpu.pipeline_mode<synchronous>, transform_indices = @transform_10, window_bounds = array<i64: 1, 32>}, {pipeline_mode = #tpu.pipeline_mode<synchronous>, transform_indices = @transform_11, window_bounds = array<i64: 32, 128>}, {pipeline_mode = #tpu.pipeline_mode<synchronous>, transform_indices = @transform_12, window_bounds = array<i64: 1, 128>}, {transform_indices = @transform_13, window_bounds = array<i64: 8, 128>}]} {
    %c0 = arith.constant 0 : index
    %c0_0 = arith.constant 0 : index
    %0 = vector.load %arg1[%c0, %c0_0] : memref<8x32xf32, #tpu.memory_space<vmem>>, vector<8x32xf32>
    %c0_1 = arith.constant 0 : index
    %c0_2 = arith.constant 0 : index
    %1 = vector.load %arg4[%c0_1, %c0_2] : memref<32x64xf32, #tpu.memory_space<vmem>>, vector<32x64xf32>
    %cst = arith.constant dense<0.000000e+00> : vector<8x64xf32>
    %2 = tpu.matmul %0, %1, %cst {dimension_numbers = #tpu.dot_dimension_numbers<[1], [0], [0], [1], [0, 0, 1, 1], [], []>} : vector<8x32xf32>, vector<32x64xf32>, vector<8x64xf32> -> vector<8x64xf32>
    %c0_3 = arith.constant 0 : index
    %c0_4 = arith.constant 0 : index
    %3 = vector.load %arg2[%c0_3, %c0_4] : memref<8x32xf32, #tpu.memory_space<vmem>>, vector<8x32xf32>
    %c0_5 = arith.constant 0 : index
    %c0_6 = arith.constant 0 : index
    %4 = vector.load %arg5[%c0_5, %c0_6] : memref<32x64xf32, #tpu.memory_space<vmem>>, vector<32x64xf32>
    %cst_7 = arith.constant dense<0.000000e+00> : vector<8x64xf32>
    %5 = tpu.matmul %3, %4, %cst_7 {dimension_numbers = #tpu.dot_dimension_numbers<[1], [0], [0], [1], [0, 0, 1, 1], [], []>} : vector<8x32xf32>, vector<32x64xf32>, vector<8x64xf32> -> vector<8x64xf32>
    %6 = arith.addf %2, %5 : vector<8x64xf32>
    %c0_8 = arith.constant 0 : index
    %c0_9 = arith.constant 0 : index
    %7 = vector.load %arg3[%c0_8, %c0_9] : memref<8x32xf32, #tpu.memory_space<vmem>>, vector<8x32xf32>
    %c0_10 = arith.constant 0 : index
    %c0_11 = arith.constant 0 : index
    %8 = vector.load %arg6[%c0_10, %c0_11] : memref<32x64xf32, #tpu.memory_space<vmem>>, vector<32x64xf32>
    %cst_12 = arith.constant dense<0.000000e+00> : vector<8x64xf32>
    %9 = tpu.matmul %7, %8, %cst_12 {dimension_numbers = #tpu.dot_dimension_numbers<[1], [0], [0], [1], [0, 0, 1, 1], [], []>} : vector<8x32xf32>, vector<32x64xf32>, vector<8x64xf32> -> vector<8x64xf32>
    %10 = arith.addf %6, %9 : vector<8x64xf32>
    %c0_13 = arith.constant 0 : index
    %c0_14 = arith.constant 0 : index
    %11 = vector.load %arg7[%c0_13, %c0_14] : memref<1x64xf32, #tpu.memory_space<vmem>>, vector<1x64xf32>
    %12 = vector.broadcast %11 : vector<1x64xf32> to vector<8x64xf32>
    %13 = arith.addf %10, %12 : vector<8x64xf32>
    %cst_15 = arith.constant 0.000000e+00 : f32
    %14 = vector.broadcast %cst_15 : f32 to vector<8x64xf32>
    %15 = arith.maximumf %13, %14 : vector<8x64xf32>
    %c0_16 = arith.constant 0 : index
    %c0_17 = arith.constant 0 : index
    %16 = vector.load %arg8[%c0_16, %c0_17] : memref<64x64xf32, #tpu.memory_space<vmem>>, vector<64x64xf32>
    %cst_18 = arith.constant dense<0.000000e+00> : vector<8x64xf32>
    %17 = tpu.matmul %15, %16, %cst_18 {dimension_numbers = #tpu.dot_dimension_numbers<[1], [0], [0], [1], [0, 0, 1, 1], [], []>} : vector<8x64xf32>, vector<64x64xf32>, vector<8x64xf32> -> vector<8x64xf32>
    %c0_19 = arith.constant 0 : index
    %c0_20 = arith.constant 0 : index
    %18 = vector.load %arg9[%c0_19, %c0_20] : memref<1x64xf32, #tpu.memory_space<vmem>>, vector<1x64xf32>
    %19 = vector.broadcast %18 : vector<1x64xf32> to vector<8x64xf32>
    %20 = arith.addf %17, %19 : vector<8x64xf32>
    %cst_21 = arith.constant 0.000000e+00 : f32
    %21 = vector.broadcast %cst_21 : f32 to vector<8x64xf32>
    %22 = arith.maximumf %20, %21 : vector<8x64xf32>
    %c0_22 = arith.constant 0 : index
    %c0_23 = arith.constant 0 : index
    %23 = vector.load %arg10[%c0_22, %c0_23] : memref<64x32xf32, #tpu.memory_space<vmem>>, vector<64x32xf32>
    %cst_24 = arith.constant dense<0.000000e+00> : vector<8x32xf32>
    %24 = tpu.matmul %22, %23, %cst_24 {dimension_numbers = #tpu.dot_dimension_numbers<[1], [0], [0], [1], [0, 0, 1, 1], [], []>} : vector<8x64xf32>, vector<64x32xf32>, vector<8x32xf32> -> vector<8x32xf32>
    %c0_25 = arith.constant 0 : index
    %c0_26 = arith.constant 0 : index
    %25 = vector.load %arg11[%c0_25, %c0_26] : memref<1x32xf32, #tpu.memory_space<vmem>>, vector<1x32xf32>
    %26 = vector.broadcast %25 : vector<1x32xf32> to vector<8x32xf32>
    %27 = arith.addf %24, %26 : vector<8x32xf32>
    %cst_27 = arith.constant 0.000000e+00 : f32
    %28 = vector.broadcast %cst_27 : f32 to vector<8x32xf32>
    %29 = arith.maximumf %27, %28 : vector<8x32xf32>
    %c0_28 = arith.constant 0 : index
    %c0_29 = arith.constant 0 : index
    %30 = vector.load %arg12[%c0_28, %c0_29] : memref<32x128xf32, #tpu.memory_space<vmem>>, vector<32x128xf32>
    %cst_30 = arith.constant dense<0.000000e+00> : vector<8x128xf32>
    %31 = tpu.matmul %29, %30, %cst_30 {dimension_numbers = #tpu.dot_dimension_numbers<[1], [0], [0], [1], [0, 0, 1, 1], [], []>} : vector<8x32xf32>, vector<32x128xf32>, vector<8x128xf32> -> vector<8x128xf32>
    %c0_31 = arith.constant 0 : index
    %c0_32 = arith.constant 0 : index
    %32 = vector.load %arg13[%c0_31, %c0_32] : memref<1x128xf32, #tpu.memory_space<vmem>>, vector<1x128xf32>
    %33 = vector.broadcast %32 : vector<1x128xf32> to vector<8x128xf32>
    %34 = arith.addf %31, %33 : vector<8x128xf32>
    %cst_33 = arith.constant dense<0xFF800000> : vector<8xf32>
    %35 = vector.multi_reduction <maximumf>, %34, %cst_33 [1] : vector<8x128xf32> to vector<8xf32>
    %36 = vector.shape_cast %35 : vector<8xf32> to vector<8x1xf32>
    %37 = vector.broadcast %36 : vector<8x1xf32> to vector<8x128xf32>
    %38 = arith.subf %34, %37 : vector<8x128xf32>
    %39 = math.exp %38 : vector<8x128xf32>
    %cst_34 = arith.constant dense<0.000000e+00> : vector<8xf32>
    %40 = vector.multi_reduction <add>, %39, %cst_34 [1] : vector<8x128xf32> to vector<8xf32>
    %41 = vector.shape_cast %40 : vector<8xf32> to vector<8x1xf32>
    %42 = math.log %41 : vector<8x1xf32>
    %43 = vector.broadcast %42 : vector<8x1xf32> to vector<8x128xf32>
    %44 = arith.subf %38, %43 : vector<8x128xf32>
    %c0_35 = arith.constant 0 : index
    %c0_36 = arith.constant 0 : index
    %45 = vector.load %arg14[%c0_35, %c0_36] : memref<8x128xf32, #tpu.memory_space<vmem>>, vector<8x128xf32>
    tpu.vector_store %arg14[%c0_35, %c0_36], %44 {strides = array<i32>} : memref<8x128xf32, #tpu.memory_space<vmem>>, vector<8x128xf32>,
    return
  }
  func.func @transform_0(%arg0: i32) -> (i32, i32) {
    %c0_i32 = arith.constant 0 : i32
    %c0_i32_0 = arith.constant 0 : i32
    return %arg0, %c0_i32 : i32, i32
  }
  func.func @transform_1(%arg0: i32) -> (i32, i32) {
    %c0_i32 = arith.constant 0 : i32
    %c0_i32_0 = arith.constant 0 : i32
    return %arg0, %c0_i32 : i32, i32
  }
  func.func @transform_2(%arg0: i32) -> (i32, i32) {
    %c0_i32 = arith.constant 0 : i32
    %c0_i32_0 = arith.constant 0 : i32
    return %arg0, %c0_i32 : i32, i32
  }
  func.func @transform_3(%arg0: i32) -> (i32, i32) {
    %c0_i32 = arith.constant 0 : i32
    %c0_i32_0 = arith.constant 0 : i32
    %c0_i32_1 = arith.constant 0 : i32
    return %c0_i32, %c0_i32_0 : i32, i32
  }
  func.func @transform_4(%arg0: i32) -> (i32, i32) {
    %c0_i32 = arith.constant 0 : i32
    %c0_i32_0 = arith.constant 0 : i32
    %c0_i32_1 = arith.constant 0 : i32
    return %c0_i32, %c0_i32_0 : i32, i32
  }
  func.func @transform_5(%arg0: i32) -> (i32, i32) {
    %c0_i32 = arith.constant 0 : i32
    %c0_i32_0 = arith.constant 0 : i32
    %c0_i32_1 = arith.constant 0 : i32
    return %c0_i32, %c0_i32_0 : i32, i32
  }
  func.func @transform_6(%arg0: i32) -> (i32, i32) {
    %c0_i32 = arith.constant 0 : i32
    %c0_i32_0 = arith.constant 0 : i32
    %c0_i32_1 = arith.constant 0 : i32
    return %c0_i32, %c0_i32_0 : i32, i32
  }
  func.func @transform_7(%arg0: i32) -> (i32, i32) {
    %c0_i32 = arith.constant 0 : i32
    %c0_i32_0 = arith.constant 0 : i32
    %c0_i32_1 = arith.constant 0 : i32
    return %c0_i32, %c0_i32_0 : i32, i32
  }
  func.func @transform_8(%arg0: i32) -> (i32, i32) {
    %c0_i32 = arith.constant 0 : i32
    %c0_i32_0 = arith.constant 0 : i32
    %c0_i32_1 = arith.constant 0 : i32
    return %c0_i32, %c0_i32_0 : i32, i32
  }
  func.func @transform_9(%arg0: i32) -> (i32, i32) {
    %c0_i32 = arith.constant 0 : i32
    %c0_i32_0 = arith.constant 0 : i32
    %c0_i32_1 = arith.constant 0 : i32
    return %c0_i32, %c0_i32_0 : i32, i32
  }
  func.func @transform_10(%arg0: i32) -> (i32, i32) {
    %c0_i32 = arith.constant 0 : i32
    %c0_i32_0 = arith.constant 0 : i32
    %c0_i32_1 = arith.constant 0 : i32
    return %c0_i32, %c0_i32_0 : i32, i32
  }
  func.func @transform_11(%arg0: i32) -> (i32, i32) {
    %c0_i32 = arith.constant 0 : i32
    %c0_i32_0 = arith.constant 0 : i32
    %c0_i32_1 = arith.constant 0 : i32
    return %c0_i32, %c0_i32_0 : i32, i32
  }
  func.func @transform_12(%arg0: i32) -> (i32, i32) {
    %c0_i32 = arith.constant 0 : i32
    %c0_i32_0 = arith.constant 0 : i32
    %c0_i32_1 = arith.constant 0 : i32
    return %c0_i32, %c0_i32_0 : i32, i32
  }
  func.func @transform_13(%arg0: i32) -> (i32, i32) {
    %c0_i32 = arith.constant 0 : i32
    %c0_i32_0 = arith.constant 0 : i32
    return %arg0, %c0_i32 : i32, i32
  }
}

module attributes {stable_mosaic.version = 11 : i64} {
  func.func @_edgeconv_fused_kernel(%arg0: i32, %arg1: memref<8x32xf32, #tpu.memory_space<vmem>>, %arg2: memref<16x32xf32, #tpu.memory_space<vmem>>, %arg3: memref<8x1xf32, #tpu.memory_space<vmem>>, %arg4: memref<16x1xf32, #tpu.memory_space<vmem>>, %arg5: memref<32x32xf32, #tpu.memory_space<vmem>>, %arg6: memref<32x32xf32, #tpu.memory_space<vmem>>, %arg7: memref<1x32xf32, #tpu.memory_space<vmem>>, %arg8: memref<32x32xf32, #tpu.memory_space<vmem>>, %arg9: memref<1x32xf32, #tpu.memory_space<vmem>>, %arg10: memref<8x32xf32, #tpu.memory_space<vmem>>) attributes {dimension_semantics = [#tpu.dimension_semantics<parallel>], iteration_bounds = array<i64: 2>, scalar_prefetch = 0 : i64, scratch_operands = 0 : i64, tpu.core_type = #tpu.core_type<tc>, window_params = [{transform_indices = @transform_0, window_bounds = array<i64: 8, 32>}, {pipeline_mode = #tpu.pipeline_mode<synchronous>, transform_indices = @transform_1, window_bounds = array<i64: 16, 32>}, {transform_indices = @transform_2, window_bounds = array<i64: 8, 1>}, {pipeline_mode = #tpu.pipeline_mode<synchronous>, transform_indices = @transform_3, window_bounds = array<i64: 16, 1>}, {pipeline_mode = #tpu.pipeline_mode<synchronous>, transform_indices = @transform_4, window_bounds = array<i64: 32, 32>}, {pipeline_mode = #tpu.pipeline_mode<synchronous>, transform_indices = @transform_5, window_bounds = array<i64: 32, 32>}, {pipeline_mode = #tpu.pipeline_mode<synchronous>, transform_indices = @transform_6, window_bounds = array<i64: 1, 32>}, {pipeline_mode = #tpu.pipeline_mode<synchronous>, transform_indices = @transform_7, window_bounds = array<i64: 32, 32>}, {pipeline_mode = #tpu.pipeline_mode<synchronous>, transform_indices = @transform_8, window_bounds = array<i64: 1, 32>}, {transform_indices = @transform_9, window_bounds = array<i64: 8, 32>}]} {
    %c0 = arith.constant 0 : index
    %c0_0 = arith.constant 0 : index
    %0 = vector.load %arg1[%c0, %c0_0] : memref<8x32xf32, #tpu.memory_space<vmem>>, vector<8x32xf32>
    %c0_1 = arith.constant 0 : index
    %c0_2 = arith.constant 0 : index
    %1 = vector.load %arg2[%c0_1, %c0_2] : memref<16x32xf32, #tpu.memory_space<vmem>>, vector<16x32xf32>
    %c0_3 = arith.constant 0 : index
    %c0_4 = arith.constant 0 : index
    %2 = vector.load %arg3[%c0_3, %c0_4] : memref<8x1xf32, #tpu.memory_space<vmem>>, vector<8x1xf32>
    %c0_5 = arith.constant 0 : index
    %c0_6 = arith.constant 0 : index
    %3 = vector.load %arg4[%c0_5, %c0_6] : memref<16x1xf32, #tpu.memory_space<vmem>>, vector<16x1xf32>
    %4 = arith.mulf %0, %0 : vector<8x32xf32>
    %cst = arith.constant dense<0.000000e+00> : vector<8xf32>
    %5 = vector.multi_reduction <add>, %4, %cst [1] : vector<8x32xf32> to vector<8xf32>
    %6 = vector.shape_cast %5 : vector<8xf32> to vector<8x1xf32>
    %7 = arith.mulf %1, %1 : vector<16x32xf32>
    %cst_7 = arith.constant dense<0.000000e+00> : vector<16xf32>
    %8 = vector.multi_reduction <add>, %7, %cst_7 [1] : vector<16x32xf32> to vector<16xf32>
    %9 = vector.shape_cast %8 : vector<16xf32> to vector<16x1xf32>
    %10 = tpu.transpose %9, [1, 0] : vector<16x1xf32> -> vector<1x16xf32>
    %11 = vector.broadcast %6 : vector<8x1xf32> to vector<8x16xf32>
    %12 = vector.broadcast %10 : vector<1x16xf32> to vector<8x16xf32>
    %13 = arith.addf %11, %12 : vector<8x16xf32>
    %14 = tpu.transpose %1, [1, 0] : vector<16x32xf32> -> vector<32x16xf32>
    %cst_8 = arith.constant dense<0.000000e+00> : vector<8x16xf32>
    %15 = tpu.matmul %0, %14, %cst_8 {dimension_numbers = #tpu.dot_dimension_numbers<[1], [0], [0], [1], [0, 0, 1, 1], [], []>} : vector<8x32xf32>, vector<32x16xf32>, vector<8x16xf32> -> vector<8x16xf32>
    %cst_9 = arith.constant 2.000000e+00 : f32
    %16 = vector.broadcast %cst_9 : f32 to vector<8x16xf32>
    %17 = arith.mulf %16, %15 : vector<8x16xf32>
    %18 = arith.subf %13, %17 : vector<8x16xf32>
    %19 = tpu.transpose %3, [1, 0] : vector<16x1xf32> -> vector<1x16xf32>
    %20 = vector.broadcast %2 : vector<8x1xf32> to vector<8x16xf32>
    %21 = vector.broadcast %19 : vector<1x16xf32> to vector<8x16xf32>
    %22 = arith.cmpf one, %20, %21 : vector<8x16xf32>
    %23 = arith.extui %22 : vector<8x16xi1> to vector<8x16xi32>
    %24 = arith.sitofp %23 : vector<8x16xi32> to vector<8x16xf32>
    %cst_10 = arith.constant 1.000000e+09 : f32
    %25 = vector.broadcast %cst_10 : f32 to vector<8x16xf32>
    %26 = arith.mulf %25, %24 : vector<8x16xf32>
    %27 = arith.addf %18, %26 : vector<8x16xf32>
    %c0_11 = arith.constant 0 : index
    %c0_12 = arith.constant 0 : index
    %28 = vector.load %arg5[%c0_11, %c0_12] : memref<32x32xf32, #tpu.memory_space<vmem>>, vector<32x32xf32>
    %cst_13 = arith.constant dense<0.000000e+00> : vector<8x32xf32>
    %29 = tpu.matmul %0, %28, %cst_13 {dimension_numbers = #tpu.dot_dimension_numbers<[1], [0], [0], [1], [0, 0, 1, 1], [], []>} : vector<8x32xf32>, vector<32x32xf32>, vector<8x32xf32> -> vector<8x32xf32>
    %c0_14 = arith.constant 0 : index
    %c0_15 = arith.constant 0 : index
    %30 = vector.load %arg7[%c0_14, %c0_15] : memref<1x32xf32, #tpu.memory_space<vmem>>, vector<1x32xf32>
    %31 = vector.broadcast %30 : vector<1x32xf32> to vector<8x32xf32>
    %32 = arith.addf %29, %31 : vector<8x32xf32>
    %c0_16 = arith.constant 0 : index
    %c0_17 = arith.constant 0 : index
    %33 = vector.load %arg6[%c0_16, %c0_17] : memref<32x32xf32, #tpu.memory_space<vmem>>, vector<32x32xf32>
    %cst_18 = arith.constant dense<0.000000e+00> : vector<16x32xf32>
    %34 = tpu.matmul %1, %33, %cst_18 {dimension_numbers = #tpu.dot_dimension_numbers<[1], [0], [0], [1], [0, 0, 1, 1], [], []>} : vector<16x32xf32>, vector<32x32xf32>, vector<16x32xf32> -> vector<16x32xf32>
    %35 = tpu.iota {dimensions = array<i32: 1>} : vector<8x16xi32>
    %36 = arith.sitofp %35 : vector<8x16xi32> to vector<8x16xf32>
    %c0_19 = arith.constant 0 : index
    %c0_20 = arith.constant 0 : index
    %37 = vector.load %arg8[%c0_19, %c0_20] : memref<32x32xf32, #tpu.memory_space<vmem>>, vector<32x32xf32>
    %c0_21 = arith.constant 0 : index
    %c0_22 = arith.constant 0 : index
    %38 = vector.load %arg9[%c0_21, %c0_22] : memref<1x32xf32, #tpu.memory_space<vmem>>, vector<1x32xf32>
    %cst_23 = arith.constant dense<0x7F800000> : vector<8xf32>
    %39 = vector.multi_reduction <minimumf>, %27, %cst_23 [1] : vector<8x16xf32> to vector<8xf32>
    %40 = vector.shape_cast %39 : vector<8xf32> to vector<8x1xf32>
    %41 = vector.broadcast %40 : vector<8x1xf32> to vector<8x16xf32>
    %42 = arith.cmpf ole, %27, %41 : vector<8x16xf32>
    %cst_24 = arith.constant 1.600000e+01 : f32
    %43 = vector.broadcast %cst_24 : f32 to vector<8x16xf32>
    %44 = arith.select %42, %36, %43 : vector<8x16xi1>, vector<8x16xf32>
    %cst_25 = arith.constant dense<0x7F800000> : vector<8xf32>
    %45 = vector.multi_reduction <minimumf>, %44, %cst_25 [1] : vector<8x16xf32> to vector<8xf32>
    %46 = vector.shape_cast %45 : vector<8xf32> to vector<8x1xf32>
    %47 = vector.broadcast %46 : vector<8x1xf32> to vector<8x16xf32>
    %48 = arith.cmpf oeq, %36, %47 : vector<8x16xf32>
    %49 = arith.extui %48 : vector<8x16xi1> to vector<8x16xi32>
    %50 = arith.sitofp %49 : vector<8x16xi32> to vector<8x16xf32>
    %cst_26 = arith.constant dense<0.000000e+00> : vector<8x32xf32>
    %51 = tpu.matmul %50, %34, %cst_26 {dimension_numbers = #tpu.dot_dimension_numbers<[1], [0], [0], [1], [0, 0, 1, 1], [], []>} : vector<8x16xf32>, vector<16x32xf32>, vector<8x32xf32> -> vector<8x32xf32>
    %52 = arith.addf %32, %51 : vector<8x32xf32>
    %cst_27 = arith.constant 0.000000e+00 : f32
    %53 = vector.broadcast %cst_27 : f32 to vector<8x32xf32>
    %54 = arith.maximumf %52, %53 : vector<8x32xf32>
    %cst_28 = arith.constant dense<0.000000e+00> : vector<8x32xf32>
    %55 = tpu.matmul %54, %37, %cst_28 {dimension_numbers = #tpu.dot_dimension_numbers<[1], [0], [0], [1], [0, 0, 1, 1], [], []>} : vector<8x32xf32>, vector<32x32xf32>, vector<8x32xf32> -> vector<8x32xf32>
    %56 = vector.broadcast %38 : vector<1x32xf32> to vector<8x32xf32>
    %57 = arith.addf %55, %56 : vector<8x32xf32>
    %cst_29 = arith.constant 1.000000e+09 : f32
    %58 = vector.broadcast %cst_29 : f32 to vector<8x16xf32>
    %59 = arith.mulf %58, %50 : vector<8x16xf32>
    %60 = arith.addf %27, %59 : vector<8x16xf32>
    %cst_30 = arith.constant dense<0x7F800000> : vector<8xf32>
    %61 = vector.multi_reduction <minimumf>, %60, %cst_30 [1] : vector<8x16xf32> to vector<8xf32>
    %62 = vector.shape_cast %61 : vector<8xf32> to vector<8x1xf32>
    %63 = vector.broadcast %62 : vector<8x1xf32> to vector<8x16xf32>
    %64 = arith.cmpf ole, %60, %63 : vector<8x16xf32>
    %cst_31 = arith.constant 1.600000e+01 : f32
    %65 = vector.broadcast %cst_31 : f32 to vector<8x16xf32>
    %66 = arith.select %64, %36, %65 : vector<8x16xi1>, vector<8x16xf32>
    %cst_32 = arith.constant dense<0x7F800000> : vector<8xf32>
    %67 = vector.multi_reduction <minimumf>, %66, %cst_32 [1] : vector<8x16xf32> to vector<8xf32>
    %68 = vector.shape_cast %67 : vector<8xf32> to vector<8x1xf32>
    %69 = vector.broadcast %68 : vector<8x1xf32> to vector<8x16xf32>
    %70 = arith.cmpf oeq, %36, %69 : vector<8x16xf32>
    %71 = arith.extui %70 : vector<8x16xi1> to vector<8x16xi32>
    %72 = arith.sitofp %71 : vector<8x16xi32> to vector<8x16xf32>
    %cst_33 = arith.constant dense<0.000000e+00> : vector<8x32xf32>
    %73 = tpu.matmul %72, %34, %cst_33 {dimension_numbers = #tpu.dot_dimension_numbers<[1], [0], [0], [1], [0, 0, 1, 1], [], []>} : vector<8x16xf32>, vector<16x32xf32>, vector<8x32xf32> -> vector<8x32xf32>
    %74 = arith.addf %32, %73 : vector<8x32xf32>
    %cst_34 = arith.constant 0.000000e+00 : f32
    %75 = vector.broadcast %cst_34 : f32 to vector<8x32xf32>
    %76 = arith.maximumf %74, %75 : vector<8x32xf32>
    %cst_35 = arith.constant dense<0.000000e+00> : vector<8x32xf32>
    %77 = tpu.matmul %76, %37, %cst_35 {dimension_numbers = #tpu.dot_dimension_numbers<[1], [0], [0], [1], [0, 0, 1, 1], [], []>} : vector<8x32xf32>, vector<32x32xf32>, vector<8x32xf32> -> vector<8x32xf32>
    %78 = vector.broadcast %38 : vector<1x32xf32> to vector<8x32xf32>
    %79 = arith.addf %77, %78 : vector<8x32xf32>
    %80 = arith.maximumf %57, %79 : vector<8x32xf32>
    %cst_36 = arith.constant 1.000000e+09 : f32
    %81 = vector.broadcast %cst_36 : f32 to vector<8x16xf32>
    %82 = arith.mulf %81, %72 : vector<8x16xf32>
    %83 = arith.addf %60, %82 : vector<8x16xf32>
    %cst_37 = arith.constant dense<0x7F800000> : vector<8xf32>
    %84 = vector.multi_reduction <minimumf>, %83, %cst_37 [1] : vector<8x16xf32> to vector<8xf32>
    %85 = vector.shape_cast %84 : vector<8xf32> to vector<8x1xf32>
    %86 = vector.broadcast %85 : vector<8x1xf32> to vector<8x16xf32>
    %87 = arith.cmpf ole, %83, %86 : vector<8x16xf32>
    %cst_38 = arith.constant 1.600000e+01 : f32
    %88 = vector.broadcast %cst_38 : f32 to vector<8x16xf32>
    %89 = arith.select %87, %36, %88 : vector<8x16xi1>, vector<8x16xf32>
    %cst_39 = arith.constant dense<0x7F800000> : vector<8xf32>
    %90 = vector.multi_reduction <minimumf>, %89, %cst_39 [1] : vector<8x16xf32> to vector<8xf32>
    %91 = vector.shape_cast %90 : vector<8xf32> to vector<8x1xf32>
    %92 = vector.broadcast %91 : vector<8x1xf32> to vector<8x16xf32>
    %93 = arith.cmpf oeq, %36, %92 : vector<8x16xf32>
    %94 = arith.extui %93 : vector<8x16xi1> to vector<8x16xi32>
    %95 = arith.sitofp %94 : vector<8x16xi32> to vector<8x16xf32>
    %cst_40 = arith.constant dense<0.000000e+00> : vector<8x32xf32>
    %96 = tpu.matmul %95, %34, %cst_40 {dimension_numbers = #tpu.dot_dimension_numbers<[1], [0], [0], [1], [0, 0, 1, 1], [], []>} : vector<8x16xf32>, vector<16x32xf32>, vector<8x32xf32> -> vector<8x32xf32>
    %97 = arith.addf %32, %96 : vector<8x32xf32>
    %cst_41 = arith.constant 0.000000e+00 : f32
    %98 = vector.broadcast %cst_41 : f32 to vector<8x32xf32>
    %99 = arith.maximumf %97, %98 : vector<8x32xf32>
    %cst_42 = arith.constant dense<0.000000e+00> : vector<8x32xf32>
    %100 = tpu.matmul %99, %37, %cst_42 {dimension_numbers = #tpu.dot_dimension_numbers<[1], [0], [0], [1], [0, 0, 1, 1], [], []>} : vector<8x32xf32>, vector<32x32xf32>, vector<8x32xf32> -> vector<8x32xf32>
    %101 = vector.broadcast %38 : vector<1x32xf32> to vector<8x32xf32>
    %102 = arith.addf %100, %101 : vector<8x32xf32>
    %103 = arith.maximumf %80, %102 : vector<8x32xf32>
    %cst_43 = arith.constant 1.000000e+09 : f32
    %104 = vector.broadcast %cst_43 : f32 to vector<8x16xf32>
    %105 = arith.mulf %104, %95 : vector<8x16xf32>
    %106 = arith.addf %83, %105 : vector<8x16xf32>
    %cst_44 = arith.constant dense<0x7F800000> : vector<8xf32>
    %107 = vector.multi_reduction <minimumf>, %106, %cst_44 [1] : vector<8x16xf32> to vector<8xf32>
    %108 = vector.shape_cast %107 : vector<8xf32> to vector<8x1xf32>
    %109 = vector.broadcast %108 : vector<8x1xf32> to vector<8x16xf32>
    %110 = arith.cmpf ole, %106, %109 : vector<8x16xf32>
    %cst_45 = arith.constant 1.600000e+01 : f32
    %111 = vector.broadcast %cst_45 : f32 to vector<8x16xf32>
    %112 = arith.select %110, %36, %111 : vector<8x16xi1>, vector<8x16xf32>
    %cst_46 = arith.constant dense<0x7F800000> : vector<8xf32>
    %113 = vector.multi_reduction <minimumf>, %112, %cst_46 [1] : vector<8x16xf32> to vector<8xf32>
    %114 = vector.shape_cast %113 : vector<8xf32> to vector<8x1xf32>
    %115 = vector.broadcast %114 : vector<8x1xf32> to vector<8x16xf32>
    %116 = arith.cmpf oeq, %36, %115 : vector<8x16xf32>
    %117 = arith.extui %116 : vector<8x16xi1> to vector<8x16xi32>
    %118 = arith.sitofp %117 : vector<8x16xi32> to vector<8x16xf32>
    %cst_47 = arith.constant dense<0.000000e+00> : vector<8x32xf32>
    %119 = tpu.matmul %118, %34, %cst_47 {dimension_numbers = #tpu.dot_dimension_numbers<[1], [0], [0], [1], [0, 0, 1, 1], [], []>} : vector<8x16xf32>, vector<16x32xf32>, vector<8x32xf32> -> vector<8x32xf32>
    %120 = arith.addf %32, %119 : vector<8x32xf32>
    %cst_48 = arith.constant 0.000000e+00 : f32
    %121 = vector.broadcast %cst_48 : f32 to vector<8x32xf32>
    %122 = arith.maximumf %120, %121 : vector<8x32xf32>
    %cst_49 = arith.constant dense<0.000000e+00> : vector<8x32xf32>
    %123 = tpu.matmul %122, %37, %cst_49 {dimension_numbers = #tpu.dot_dimension_numbers<[1], [0], [0], [1], [0, 0, 1, 1], [], []>} : vector<8x32xf32>, vector<32x32xf32>, vector<8x32xf32> -> vector<8x32xf32>
    %124 = vector.broadcast %38 : vector<1x32xf32> to vector<8x32xf32>
    %125 = arith.addf %123, %124 : vector<8x32xf32>
    %126 = arith.maximumf %103, %125 : vector<8x32xf32>
    %c0_50 = arith.constant 0 : index
    %c0_51 = arith.constant 0 : index
    %127 = vector.load %arg10[%c0_50, %c0_51] : memref<8x32xf32, #tpu.memory_space<vmem>>, vector<8x32xf32>
    tpu.vector_store %arg10[%c0_50, %c0_51], %126 {strides = array<i32>} : memref<8x32xf32, #tpu.memory_space<vmem>>, vector<8x32xf32>,
    return
  }
  func.func @transform_0(%arg0: i32) -> (i32, i32) {
    %c0_i32 = arith.constant 0 : i32
    %c0_i32_0 = arith.constant 0 : i32
    return %arg0, %c0_i32 : i32, i32
  }
  func.func @transform_1(%arg0: i32) -> (i32, i32) {
    %c0_i32 = arith.constant 0 : i32
    %c0_i32_0 = arith.constant 0 : i32
    %c0_i32_1 = arith.constant 0 : i32
    return %c0_i32, %c0_i32_0 : i32, i32
  }
  func.func @transform_2(%arg0: i32) -> (i32, i32) {
    %c0_i32 = arith.constant 0 : i32
    %c0_i32_0 = arith.constant 0 : i32
    return %arg0, %c0_i32 : i32, i32
  }
  func.func @transform_3(%arg0: i32) -> (i32, i32) {
    %c0_i32 = arith.constant 0 : i32
    %c0_i32_0 = arith.constant 0 : i32
    %c0_i32_1 = arith.constant 0 : i32
    return %c0_i32, %c0_i32_0 : i32, i32
  }
  func.func @transform_4(%arg0: i32) -> (i32, i32) {
    %c0_i32 = arith.constant 0 : i32
    %c0_i32_0 = arith.constant 0 : i32
    %c0_i32_1 = arith.constant 0 : i32
    return %c0_i32, %c0_i32_0 : i32, i32
  }
  func.func @transform_5(%arg0: i32) -> (i32, i32) {
    %c0_i32 = arith.constant 0 : i32
    %c0_i32_0 = arith.constant 0 : i32
    %c0_i32_1 = arith.constant 0 : i32
    return %c0_i32, %c0_i32_0 : i32, i32
  }
  func.func @transform_6(%arg0: i32) -> (i32, i32) {
    %c0_i32 = arith.constant 0 : i32
    %c0_i32_0 = arith.constant 0 : i32
    %c0_i32_1 = arith.constant 0 : i32
    return %c0_i32, %c0_i32_0 : i32, i32
  }
  func.func @transform_7(%arg0: i32) -> (i32, i32) {
    %c0_i32 = arith.constant 0 : i32
    %c0_i32_0 = arith.constant 0 : i32
    %c0_i32_1 = arith.constant 0 : i32
    return %c0_i32, %c0_i32_0 : i32, i32
  }
  func.func @transform_8(%arg0: i32) -> (i32, i32) {
    %c0_i32 = arith.constant 0 : i32
    %c0_i32_0 = arith.constant 0 : i32
    %c0_i32_1 = arith.constant 0 : i32
    return %c0_i32, %c0_i32_0 : i32, i32
  }
  func.func @transform_9(%arg0: i32) -> (i32, i32) {
    %c0_i32 = arith.constant 0 : i32
    %c0_i32_0 = arith.constant 0 : i32
    return %arg0, %c0_i32 : i32, i32
  }
}

</mosaic_0001>

<bundles_post_ra>
// kernel: dgcnn_forward.7
= control target key start
LH: loop header
LB: loop body
LE: loop exit
PB: predicated region body
PF: predicated region fallthrough
CT: control target
= control target key end

     0   :  { %s1351_s25 = smov 0   ;;  %s1522_s0 = inlined_call_operand.vmem [shape: f32[16,32], index: 0, kind: input, shape index: {}]   ;;  %s1523_s1 = inlined_call_operand.vmem [shape: f32[16,32], index: 1, kind: input, shape index: {}]   ;;  %s1524_s2 = inlined_call_operand.vmem [shape: f32[16,32], index: 2, kind: input, shape index: {}]   ;;  %s1525_s3 = inlined_call_operand.vmem [shape: f32[32,64], index: 3, kind: input, shape index: {}]   ;;  %s1526_s4 = inlined_call_operand.vmem [shape: f32[32,64], index: 4, kind: input, shape index: {}]   ;;  %s1527_s5 = inlined_call_operand.vmem [shape: f32[32,64], index: 5, kind: input, shape index: {}]   ;;  %s1528_s6 = inlined_call_operand.vmem [shape: f32[1,64], index: 6, kind: input, shape index: {}]   ;;  %s1529_s7 = inlined_call_operand.vmem [shape: f32[64,64], index: 7, kind: input, shape index: {}]   ;;  %s1530_s8 = inlined_call_operand.vmem [shape: f32[1,64], index: 8, kind: input, shape index: {}]   ;;  %s1531_s9 = inlined_call_operand.vmem [shape: f32[64,32], index: 9, kind: input, shape index: {}]   ;;  %s1532_s10 = inlined_call_operand.vmem [shape: f32[1,32], index: 10, kind: input, shape index: {}]   ;;  %s1533_s11 = inlined_call_operand.vmem [shape: f32[32,128], index: 11, kind: input, shape index: {}]   ;;  %s1534_s12 = inlined_call_operand.vmem [shape: f32[1,128], index: 12, kind: input, shape index: {}]   ;;  %s1535_s13 = inlined_call_operand.vmem [shape: f32[16,128], index: 13, kind: output, shape index: {}]  }
   0x1 LB: > { %s1066_s26 = sadd.s32 4294967295, %s1276_s25   ;;  %p1070_p0 = scmp.ge.s32.totalorder %s1276_s25, 1  ;;  %s1276_s25 = sphi %s1351_s25, %s23_s25  }
   0x2   : > { %p404_p1 = scmp.lt.s32.totalorder %s1276_s25, 3 }
   0x4   : > { %p405_p2 = pnand %p1070_p0, %p404_p1 }
   0x5   : > { %v476_v0 = vld [vmem:[%s1526_s4] sm:$0xff] (!%p405_p2)  ;;  %v477_v1 = vld [vmem:[%s1526_s4 + $0x8] sm:$0xff] (!%p405_p2)  ;;  %v1278_v3 = vmov (!%p405_p2), 0.0|0.0   ;;  %v478_v6 = vld [vmem:[%s1526_s4 + $0x10] sm:$0xff] (!%p405_p2)  ;;  %p454_p3 = scmp.lt.s32.totalorder (!%p405_p2), %s1066_s26, 1  ;;  %vm1279_vm0 = vmmov (!%p405_p2), 0  }
   0x6   : > { %408 = sbr.rel (%p405_p2) target bundleno = 1204 (0x4b4), region = 72  ;;  %v471_v2 = vld [vmem:[%s1525_s3] sm:$0xff] (!%p405_p2)  ;;  %1207 = vmatprep.subr.bf16.mxu0 (!%p405_p2), %v1278_v3  ;;  %v1208_v4 = vpack.c.bf16 (!%p405_p2), %v477_v1, %v476_v0  ;;  %1213 = vmatprep.subr.bf16.mxu1 (!%p405_p2), %v1278_v3  ;;  %v472_v5 = vld [vmem:[%s1525_s3 + $0x8] sm:$0xff] (!%p405_p2)  ;;  %v479_v7 = vld [vmem:[%s1526_s4 + $0x18] sm:$0xff] (!%p405_p2)  ;;  %v1280_v11 = vmov (!%p405_p2), 0.0   ;;  %vm480_vm1 = vcmask (!%p405_p2), 261120  }
   0x7   : > { %v1214_v8 = vpack.c.bf16 (!%p405_p2), %v472_v5, %v471_v2  ;;  %v473_v9 = vld [vmem:[%s1525_s3 + $0x10] sm:$0xff] (!%p405_p2)  ;;  %v474_v10 = vld [vmem:[%s1525_s3 + $0x18] sm:$0xff] (!%p405_p2)  ;;  %1133 = vmatprep.mubr.msk.f32.mxu0 (!%p405_p2), %vm1279_vm0, %v1280_v11  ;;  %1144 = vmatprep.mubr.msk.f32.mxu1 (!%p405_p2), %vm1279_vm0, %v1280_v11  ;;  %v1211_v12 = vpack.c.bf16 (!%p405_p2), %v479_v7, %v478_v6  ;;  %v628_v14 = vld [vmem:[%s1527_s5] sm:$0xff] (!%p405_p2)  ;;  %vm730_vm2 = vcmask (!%p405_p2), 523264  }
   0x8   : > { %1209 = vmatpush3.bf16.msra.mxu0 (!%p405_p2), %v1208_v4  ;;  %v1217_v13 = vpack.c.bf16 (!%p405_p2), %v474_v10, %v473_v9  ;;  %v629_v15 = vld [vmem:[%s1527_s5 + $0x8] sm:$0xff] (!%p405_p2)  ;;  %v630_v19 = vld [vmem:[%s1527_s5 + $0x10] sm:$0xff] (!%p405_p2)  ;;  %v631_v20 = vld [vmem:[%s1527_s5 + $0x18] sm:$0xff] (!%p405_p2) }
   0x9   : > { %1215 = vmatpush3.bf16.msra.mxu1 (!%p405_p2), %v1214_v8  ;;  %1210 = vmatprep.subr.bf16.mxu0 (!%p405_p2), %v1278_v3  ;;  %v1220_v17 = vpack.c.bf16 (!%p405_p2), %v629_v15, %v628_v14  ;;  %v1223_v21 = vpack.c.bf16 (!%p405_p2), %v631_v20, %v630_v19  ;;  %v715_v23 = vld [vmem:[%s1529_s7] sm:$0xff] (!%p405_p2)  ;;  %v716_v24 = vld [vmem:[%s1529_s7 + $0x8] sm:$0xff] (!%p405_p2)  ;;  %v717_v26 = vld [vmem:[%s1529_s7 + $0x10] sm:$0xff] (!%p405_p2) }
   0xa   : > { %1216 = vmatprep.subr.bf16.mxu1 (!%p405_p2), %v1278_v3  ;;  %v1226_v25 = vpack.c.bf16 (!%p405_p2), %v716_v24, %v715_v23  ;;  %v718_v27 = vld [vmem:[%s1529_s7 + $0x18] sm:$0xff] (!%p405_p2)  ;;  %v719_v29 = vld [vmem:[%s1529_s7 + $0x20] sm:$0xff] (!%p405_p2)  ;;  %v720_v30 = vld [vmem:[%s1529_s7 + $0x28] sm:$0xff] (!%p405_p2) }
   0xb   : > { %v1229_v28 = vpack.c.bf16 (!%p405_p2), %v718_v27, %v717_v26  ;;  %v1232_v31 = vpack.c.bf16 (!%p405_p2), %v720_v30, %v719_v29  ;;  %v721_v32 = vld [vmem:[%s1529_s7 + $0x30] sm:$0xff] (!%p405_p2)  ;;  %v722_v33 = vld [vmem:[%s1529_s7 + $0x38] sm:$0xff] (!%p405_p2)  ;;  %v805_v35 = vld [vmem:[%s1531_s9] sm:$0xff] (!%p405_p2) }
   0xc   : > { %1212 = vmatpush3.bf16.msra.mxu0 (!%p405_p2), %v1211_v12  ;;  %v1235_v34 = vpack.c.bf16 (!%p405_p2), %v722_v33, %v721_v32  ;;  %v806_v36 = vld [vmem:[%s1531_s9 + $0x8] sm:$0xff] (!%p405_p2)  ;;  %v807_v37 = vld [vmem:[%s1531_s9 + $0x10] sm:$0xff] (!%p405_p2)  ;;  %v808_v39 = vld [vmem:[%s1531_s9 + $0x18] sm:$0xff] (!%p405_p2) }
   0xd   : > { %s1537_s26 = smov (!%p454_p3, %s1066_s26), 1  ;;  %1218 = vmatpush3.bf16.msra.mxu1 %v1217_v13  ;;  %1219 = vmatprep.subr.bf16.mxu0 %v1278_v3  ;;  %v1238_v38 = vpack.c.bf16 %v806_v36, %v805_v35  ;;  %v1241_v40 = vpack.c.bf16 %v808_v39, %v807_v37  ;;  %v809_v41 = vld [vmem:[%s1531_s9 + $0x20] sm:$0xff]  ;;  %v810_v42 = vld [vmem:[%s1531_s9 + $0x28] sm:$0xff]  ;;  %v811_v55 = vld [vmem:[%s1531_s9 + $0x30] sm:$0xff] }
   0xe   : > { %s1397_s15 = sshll.u32 %s1537_s26, 3  ;;  %1225 = vmatprep.subr.bf16.mxu1 %v1278_v3  ;;  %v1244_v43 = vpack.c.bf16 %v810_v42, %v809_v41  ;;  %v1078_v50 = vld [vmem:[%s1528_s6] ss:$0 sm:$0xff]  ;;  %v812_v56 = vld [vmem:[%s1531_s9 + $0x38] sm:$0xff]  ;;  %v895_v59 = vld [vmem:[%s1533_s11 + $0x8] sm:$0xff] }
   0xf   : > { %s461_s18 = scalar_lea.vmem %s1523_s1, %s1397_s15  ;;  %s457_s21 = scalar_lea.vmem %s1522_s0, %s1397_s15  ;;  %v1247_v57 = vpack.c.bf16 %v812_v56, %v811_v55  ;;  %v894_v58 = vld [vmem:[%s1533_s11] sm:$0xff]  ;;  %v896_v2 = vld [vmem:[%s1533_s11 + $0x10] sm:$0xff]  ;;  %v897_v4 = vld [vmem:[%s1533_s11 + $0x18] sm:$0xff] }
  0x10   : > { %v475_v16 = vld [vmem:[%s461_s18] sm:$0xff]  ;;  %s465_s29 = scalar_lea.vmem %s1524_s2, %s1397_s15  ;;  %v1250_v60 = vpack.c.bf16 %v895_v59, %v894_v58  ;;  %v1253_v5 = vpack.c.bf16 %v897_v4, %v896_v2  ;;  %s469_s19 = scalar_lea.vmem %s1535_s13, %s1397_s15 }
  0x11   : > { %v470_v18 = vld [vmem:[%s457_s21] sm:$0xff]  ;;  %1134 = vmatmul.mubr.msk.f32.vlgmr.msra.gmra.mrb[0].mxu0 %vm480_vm1, %v475_v16 }
  0x12   : > { %1145 = vmatmul.mubr.msk.f32.vlgmr.msra.gmra.mrb[0].mxu1 %vm480_vm1, %v470_v18  ;;  %1221 = vmatpush3.bf16.msra.mxu0 %v1220_v17  ;;  %v627_v22 = vld [vmem:[%s465_s29] sm:$0xff] }
  0x13   : > { %1222 = vmatprep.subr.bf16.mxu0 %v1278_v3  ;;  %1155 = vmatprep.mubr.msk.f32.mxu0 %vm1279_vm0, %v1280_v11  ;;  %v1079_v61 = vld [vmem:[%s1530_s8] ss:$0 sm:$0xff] }
  0x14   : > { %1174 = vmatprep.mubr.msk.f32.mxu1 %vm1279_vm0, %v1280_v11  ;;  %1227 = vmatpush3.bf16.msra.mxu1 %v1226_v25  ;;  %v1083_v10 = vld [vmem:[%s1534_s12] ss:$0 sm:$0xff] }
  0x15   : > { %1228 = vmatprep.subr.bf16.mxu1 %v1278_v3 }
  0x16   : > { %1224 = vmatpush3.bf16.msra.mxu0 %v1223_v21 }
  0x17   : > { %1237 = vmatprep.subr.bf16.mxu0 %v1278_v3 }
  0x18   : > { %1230 = vmatpush3.bf16.msra.mxu1 %v1229_v28 }
  0x19   : > { %1156 = vmatmul.mubr.msk.f32.vlgmr.msra.gmra.mrb[2].mxu0 %vm480_vm1, %v627_v22  ;;  %1231 = vmatprep.subr.bf16.mxu1 %v1278_v3 }
  0x1a   : > { %1193 = vmatprep.mubr.msk.f32.mxu0 %vm1279_vm0, %v1280_v11  ;;  %1239 = vmatpush3.bf16.msra.mxu0 %v1238_v38 }
  0x1b   : > { %1240 = vmatprep.subr.bf16.mxu0 %v1278_v3 }
  0x1c   : > { %1233 = vmatpush3.bf16.msra.mxu1 %v1232_v31 }
  0x1d   : > { %1234 = vmatprep.subr.bf16.mxu1 %v1278_v3 }
  0x1e   : > { %1242 = vmatpush3.bf16.msra.mxu0 %v1241_v40 }
  0x1f   : > { %1243 = vmatprep.subr.bf16.mxu0 %v1278_v3 }
  0x20   : > { %1236 = vmatpush3.bf16.msra.mxu1 %v1235_v34 }
  0x21   : > { %1249 = vmatprep.subr.bf16.mxu1 %v1278_v3 }
  0x22   : > { %1245 = vmatpush3.bf16.msra.mxu0 %v1244_v43 }
  0x23   : > { %1246 = vmatprep.subr.bf16.mxu0 %v1278_v3 }
  0x26   : > { %1248 = vmatpush3.bf16.msra.mxu0 %v1247_v57 }
  0xe4   : > { %v550_v44 = vpop.f32.mrb[0].mxu0 }
  0xe5   : > { %v1135_v45 = vpop.f32.mrb[1].mxu0  ;;  %v623_v46 = vpop.f32.mrb[0].mxu1 }
  0xe6   : > { %v624_v47 = vadd.f32 %v623_v46, %v550_v44  ;;  %v1146_v48 = vpop.f32.mrb[1].mxu1 }
  0xec   : > { %v701_v49 = vpop.f32.mrb[2].mxu0 }
  0xed   : > { %v705_v51 = vadd.f32 %v701_v49, %v624_v47  ;;  %v1157_v52 = vpop.f32.mrb[3].mxu0 }
  0xef   : > { %v713_v53 = vadd.f32 %v1078_v50, %v705_v51 }
  0xf1   : > { %v714_v54 = vmax.f32 %v713_v53, 0.0 }
  0xf3   : > { %1175 = vmatmul.mubr.msk.f32.vlgmr.msra.gmra.mrb[2].mxu1 %vm730_vm2, %v714_v54 }
  0xf4   : > { %1204 = vmatprep.mubr.msk.f32.mxu1 %vm1279_vm0, %v1280_v11  ;;  %1251 = vmatpush3.bf16.msra.mxu1 %v1250_v60 }
  0xf5   : > { %1252 = vmatprep.subr.bf16.mxu1 %v1278_v3  ;;  %v1081_v3 = vld [vmem:[%s1532_s10] ss:$0 sm:$0xff] }
  0xf8   : > { %1254 = vmatpush3.bf16.msra.mxu1 %v1253_v5 }
 0x1c6   : > { %v800_v62 = vpop.f32.mrb[2].mxu1 }
 0x1c7   : > { %v801_v63 = vadd.f32 %v1079_v61, %v800_v62  ;;  %v1176_v0 = vpop.f32.mrb[3].mxu1 }
 0x1c9   : > { %v804_v1 = vmax.f32 %v801_v63, 0.0 }
 0x1cb   : > { %1194 = vmatmul.mubr.msk.f32.vlgmr.msra.gmra.mrb[4].mxu0 %vm730_vm2, %v804_v1 }
 0x29e   : > { %v889_v6 = vpop.f32.mrb[4].mxu0 }
 0x29f   : > { %v890_v7 = vadd.f32 %v1081_v3, %v889_v6  ;;  %v1195_v8 = vpop.f32.mrb[5].mxu0 }
 0x2a1   : > { %v893_v9 = vmax.f32 %v890_v7, 0.0 }
 0x2a3   : > { %1205 = vmatmul.mubr.msk.f32.vlgmr.msra.gmra.mrb[4].mxu1 %vm480_vm1, %v893_v9 }
 0x376   : > { %v974_v11 = vpop.f32.mrb[4].mxu1 }
 0x377   : > { %v975_v12 = vadd.f32 %v1083_v10, %v974_v11  ;;  %v1206_v13 = vpop.f32.mrb[5].mxu1 }
 0x379   : > { %978 = vmax.xlane.f32.xlu0 %v975_v12 }
 0x406   : > { %v979_v14 = vpop.xlane.xlu0 %978 }
 0x407   : > { %v980_v15 = vsub.f32 %v975_v12, %v979_v14 }
 0x409   : > { %v981_v16 = vmul.f32 1.442695, %v980_v15 }
 0x40b   : > { %1266 = vpow2.f32 %v981_v16 }
 0x415   : > { %v1267_v17 = vpop.eup %1266 }
 0x416   : > { %983 = vadd.xlane.f32.xlu0 %v1267_v17 }
 0x4a3   : > { %v984_v18 = vpop.xlane.xlu0 %983 }
 0x4a4   : > { %1268 = vlog2.f32 %v984_v18 }
 0x4ae   : > { %v1269_v19 = vpop.eup %1268 }
 0x4af   : > { %v986_v20 = vmul.f32 0.6931472, %v1269_v19 }
 0x4b1   : > { %v987_v21 = vsub.f32 %v980_v15, %v986_v20 }
 0x4b3   : > { %988 = vst [vmem:[%s469_s19] sm:$0xff] %v987_v21 }
 0x4b4 PF: > { %s23_s25 = sadd.s32 1, %s1276_s25  }
 0x4b5   : > { %p20_p4 = scmp.ge.s32.totalorder %s23_s25, 4  }
 0x4b7   :  { %22 = sbr.rel (!%p20_p4) target bundleno = 1 (0x1), region = 108 }

// kernel: dgcnn_forward.4
= control target key start
LH: loop header
LB: loop body
LE: loop exit
PB: predicated region body
PF: predicated region fallthrough
CT: control target
= control target key end

     0   :  { %s1685_s30 = smov 0   ;;  %s1845_s0 = inlined_call_operand.vmem [shape: f32[16,8], index: 0, kind: input, shape index: {}, may-alias: {0,1}]   ;;  %s1846_s1 = inlined_call_operand.vmem [shape: f32[16,8], index: 1, kind: input, shape index: {}, may-alias: {0,1}]   ;;  %s1847_s2 = inlined_call_operand.vmem [shape: f32[16,1], index: 2, kind: input, shape index: {}, may-alias: {2,3}]   ;;  %s1848_s3 = inlined_call_operand.vmem [shape: f32[16,1], index: 3, kind: input, shape index: {}, may-alias: {2,3}]   ;;  %s1849_s4 = inlined_call_operand.vmem [shape: f32[8,32], index: 4, kind: input, shape index: {}]   ;;  %s1850_s5 = inlined_call_operand.vmem [shape: f32[8,32], index: 5, kind: input, shape index: {}]   ;;  %s1851_s6 = inlined_call_operand.vmem [shape: f32[1,32], index: 6, kind: input, shape index: {}]   ;;  %s1852_s7 = inlined_call_operand.vmem [shape: f32[32,32], index: 7, kind: input, shape index: {}]   ;;  %s1853_s8 = inlined_call_operand.vmem [shape: f32[1,32], index: 8, kind: input, shape index: {}]   ;;  %s1854_s9 = inlined_call_operand.vmem [shape: f32[16,32], index: 9, kind: output, shape index: {}]  }
   0x1 LB: > { %s1409_s10 = sadd.s32 4294967295, %s1629_s30   ;;  %p1413_p0 = scmp.ge.s32.totalorder %s1629_s30, 1  ;;  %s1629_s30 = sphi %s1685_s30, %s19_s30  }
   0x2   : > { %p295_p1 = scmp.lt.s32.totalorder %s1629_s30, 3 }
   0x4   : > { %p296_p2 = pnand %p1413_p0, %p295_p1 }
   0x5   : > { %v346_v0 = vld [vmem:[%s1846_s1] sm:$0xff] (!%p296_p2)  ;;  %vm352_vm0 = vcmask (!%p296_p2), 64512   ;;  %v347_v1 = vld [vmem:[%s1846_s1 + $0x8] sm:$0xff] (!%p296_p2)  ;;  %p333_p3 = scmp.lt.s32.totalorder (!%p296_p2), %s1409_s10, 1  ;;  %v1631_v4 = vmov (!%p296_p2), 0.0|0.0   ;;  %v1632_v6 = vmov (!%p296_p2), 0   ;;  %v396_v22 = vlaneseq (!%p296_p2) }
   0x6   : > { %299 = sbr.rel (%p296_p2) target bundleno = 1893 (0x765), region = 56  ;;  %v356_v2 = vmul.f32 (!%p296_p2), %v346_v0, %v346_v0  ;;  %v357_v3 = vmul.f32 (!%p296_p2), %v347_v1, %v347_v1  ;;  %1569 = vmatprep.subr.bf16.mxu0 (!%p296_p2), %v1631_v4  ;;  %v1570_v5 = vpack.c.bf16 (!%p296_p2), %v347_v1, %v346_v0  ;;  %vm1571_vm1 = vmpackc.low (!%p296_p2), %vm352_vm0, %vm352_vm0  ;;  %1621 = vset.pattern.permute.xlu1 (!%p296_p2), %v1632_v6  ;;  %vm1633_vm2 = vmmov (!%p296_p2), 0   ;;  %v349_v14 = vld [vmem:[%s1848_s3] sm:$0xff] (!%p296_p2)  ;;  %v350_v15 = vld [vmem:[%s1848_s3 + $0x8] sm:$0xff] (!%p296_p2) }
   0x7   : > { %1494 = vmatprep.mubr.msk.f32.mxu1 (!%p296_p2), %vm352_vm0, %v346_v0  ;;  %v1634_v8 = vmov (!%p296_p2), 0.0   ;;  %v606_v18 = vld [vmem:[%s1850_s5] sm:$0xff] (!%p296_p2)  ;;  %v397_v24 = vshrl.u32 (!%p296_p2), %v396_v22, 7  ;;  %vm690_vm4 = vcmask (!%p296_p2), 130048   ;;  %v683_v41 = vand.u32 (!%p296_p2), 127, %v396_v22  ;;  %v686_v53 = vld [vmem:[%s1852_s7 + $0x8] sm:$0xff] (!%p296_p2) }
   0x8   : > { %v358_v7 = vsel (!%p296_p2), %vm352_vm0, %v356_v2, 0.0  ;;  %1572 = vmatpush3.bf16.xpose.msk.msra.mxu0 (!%p296_p2), %vm1571_vm1, %v1570_v5  ;;  %1484 = vmatprep.mubr.msk.f32.mxu0 (!%p296_p2), %vm1633_vm2, %v1634_v8  ;;  %v361_v9 = vsel (!%p296_p2), %vm352_vm0, %v357_v3, 0.0  ;;  %v528_v37 = vld [vmem:[%s1849_s4] sm:$0xff] (!%p296_p2)  ;;  %v687_v56 = vld [vmem:[%s1852_s7 + $0x10] sm:$0xff] (!%p296_p2)  ;;  %v688_v57 = vld [vmem:[%s1852_s7 + $0x18] sm:$0xff] (!%p296_p2)  ;;  %vm783_vm8 = vcmask (!%p296_p2), 261120  }
   0x9   : > { %359 = vadd.xlane.f32.xlu0 (!%p296_p2), %v358_v7  ;;  %1487 = vmatprep.subr.mxu0 (!%p296_p2), %v1634_v8  ;;  %v398_v25 = vsub.s32 (!%p296_p2), 0, %v397_v24  ;;  %v1748_v42 = vcvt.s32.f32 (!%p296_p2), %v683_v41  ;;  %v685_v52 = vld [vmem:[%s1852_s7] sm:$0xff] (!%p296_p2)  ;;  %v1776_v58 = vpack.c.bf16 (!%p296_p2), %v688_v57, %v687_v56 }
   0xa   : > { %1492 = vmatprep.subr.mxu1 (!%p296_p2), %v606_v18  ;;  %v1766_v54 = vpack.c.bf16 (!%p296_p2), %v686_v53, %v685_v52  ;;  %v1421_v62 = vld [vmem:[%s1851_s6] ss:$0 sm:$0xff] (!%p296_p2) }
   0xb   : > { %1493 = vmatpush3.msra.mxu1 (!%p296_p2), %v606_v18 }
   0xc   : > { %1495 = vmatmul.mubr.msk.f32.vlgmr.msra.gmra.mrb[0].mxu1 (!%p296_p2), %vm352_vm0, %v347_v1  ;;  %1573 = vmatprep.subr.bf16.mxu1 (!%p296_p2), %v1631_v4 }
   0xd   : > { %s1856_s10 = smov (!%p333_p3, %s1409_s10), 1  ;;  %362 = vadd.xlane.f32.xlu0 %v361_v9  ;;  %1501 = vmatprep.mubr.msk.f32.mxu1 %vm1633_vm2, %v1634_v8 }
   0xe   : > { %s1706_s15 = sshll.u32 %s1856_s10, 3 }
   0xf   : > { %s336_s18 = scalar_lea.vmem %s1845_s0, %s1706_s15  ;;  %s340_s21 = scalar_lea.vmem %s1847_s2, %s1706_s15 }
  0x10   : > { %v345_v10 = vld [vmem:[%s336_s18] sm:$0xff]  ;;  %s344_s25 = scalar_lea.vmem %s1854_s9, %s1706_s15 }
  0x11   : > { %v351_v11 = vmul.f32 %v345_v10, %v345_v10  ;;  %1485 = vmatmul.mubr.msk.f32.vlgmr.msra.gmra.mrb[0].mxu0 %vm352_vm0, %v345_v10  ;;  %v348_v13 = vld [vmem:[%s340_s21] sm:$0xff] }
  0x12   : > { %1489 = vmatprep.mubr.msk.f32.mxu0 %vm1633_vm2, %v1634_v8  ;;  %1488 = vmatpush3.msra.mxu0 %v528_v37 }
  0x13   : > { %v353_v12 = vsel %vm352_vm0, %v351_v11, 0.0  ;;  %1576 = vmatprep.subr.bf16.mxu0 %v1631_v4 }
  0x14   : > { %354 = vadd.xlane.f32.xlu1 %v353_v12 }
  0x15   : > { %1490 = vmatmul.mubr.msk.f32.vlgmr.msra.gmra.mrb[2].mxu0 %vm352_vm0, %v345_v10 }
  0x16   : > { %1512 = vmatprep.mubr.msk.f32.mxu0 %vm1633_vm2, %v1634_v8  ;;  %1578 = vmatpush3.bf16.msra.mxu0 %v1766_v54 }
  0x17   : > { %1579 = vmatprep.subr.bf16.mxu0 %v1631_v4 }
  0x1a   : > { %1581 = vmatpush3.bf16.msra.mxu0 %v1776_v58 }
  0x1b   : > { %1591 = vmatprep.subr.bf16.mxu0 %v1631_v4 }
  0x25   : > { %516 = vperm.xlu1 %1621, %v348_v13  }
  0x4e   : > { %482 = vxpose.xlu1.b32.start [1/2] (short) (narrow) %v349_v14, 8 }
  0x52   : > { %483 = vxpose.xlu1.b32.end [2/2] (short) (narrow) %v350_v15, 8 }
  0x96   : > { %v360_v16 = vpop.xlane.xlu0 %359 }
  0x97   : > { %364 = vxpose.xlu0.b32.start [1/2] (short) (narrow) %v360_v16, 8 }
  0x9a   : > { %v363_v17 = vpop.xlane.xlu0 %362 }
  0x9b   : > { %365 = vxpose.xlu0.b32.end [2/2] (short) (narrow) %v363_v17, 8 }
  0xa1   : > { %v355_v21 = vpop.xlane.xlu1 %354 }
  0xa5   : > { %v517_v23 = vpop.permute.xlu1 %516 }
  0xc4   : > { %1622 = vset.pattern.permute.xlu0 %v1632_v6 }
  0xce   : > { %v498_v26 = vpop.trf.xlu1 }
  0xcf   : > { %v522_v27 = vrot.slane %v498_v26, %v398_v25 }
  0xd1   : > { %vm523_vm3 = vcmp.ne.f32.partialorder %v517_v23, %v522_v27 }
  0xd2   : > { %v1420_v31 = vsel %vm523_vm3, 1.0, %v1634_v8 }
  0xd3   : > { %v526_v33 = vmul.f32 1e+09, %v1420_v31 }
  0xdf   : > { %v1496_v38 = vpop.f32.mrb[0].mxu1 }
  0xe0   : > { %v673_v39 = vpop.f32.mrb[1].mxu1 }
  0xe1   : > { %v1744_v40 = vpack.c.bf16 %v1496_v38, %v673_v39 }
  0xe3   : > { %1575 = vmatpush3.bf16.msra.mxu1 %v1744_v40 }
  0xe4   : > { %v476_v19 = vpop.f32.mrb[0].mxu0  ;;  %1582 = vmatprep.subr.bf16.mxu1 %v1631_v4 }
  0xe5   : > { %v1486_v20 = vpop.f32.mrb[1].mxu0  ;;  %v480_v30 = vmul.f32 2.0, %v476_v19 }
  0xe8   : > { %v602_v51 = vpop.f32.mrb[2].mxu0 }
  0xe9   : > { %v1491_v55 = vpop.f32.mrb[3].mxu0  ;;  %v1785_v63 = vadd.f32 %v1421_v62, %v602_v51 }
 0x117   : > { %v380_v28 = vpop.trf.xlu0 }
 0x118   : > { %v399_v29 = vrot.slane %v380_v28, %v398_v25  ;;  %v1427_v25 = vld [vmem:[%s1853_s8] ss:$0 sm:$0xff] }
 0x11a   : > { %v400_v32 = vadd.f32 %v399_v29, %v355_v21 }
 0x11c   : > { %v481_v34 = vsub.f32 %v400_v32, %v480_v30 }
 0x11e   : > { %v527_v35 = vadd.f32 %v526_v33, %v481_v34 }
 0x120   : > { %v691_v36 = vsel %vm690_vm4, %v527_v35, inf }
 0x121   : > { %692 = vmin.xlane.f32.xlu0 %v691_v36 }
 0x1ae   : > { %v693_v43 = vpop.xlane.xlu0 %692 }
 0x1af   : > { %vm694_vm5 = vcmp.le.f32.partialorder %v527_v35, %v693_v43 }
 0x1b0   : > { %v695_v44 = vsel %vm694_vm5, %v1748_v42, 16.0 }
 0x1b1   : > { %v696_v45 = vsel %vm690_vm4, %v695_v44, inf }
 0x1b2   : > { %697 = vmin.xlane.f32.xlu1 %v696_v45 }
 0x23f   : > { %v698_v46 = vpop.xlane.xlu1 %697 }
 0x240   : > { %vm699_vm6 = vcmp.eq.f32.partialorder %v1748_v42, %v698_v46 }
 0x241   : > { %v1425_v47 = vsel %vm699_vm6, 1.0, %v1634_v8 }
 0x242   : > { %v857_v48 = vmul.f32 1e+09, %v1425_v47  ;;  %1502 = vmatmul.mubr.msk.f32.vlgmr.msra.gmra.mrb[2].mxu1 %vm690_vm4, %v1425_v47 }
 0x243   : > { %1584 = vmatpush3.bf16.msra.mxu1 %v1744_v40  ;;  %1519 = vmatprep.mubr.msk.f32.mxu1 %vm1633_vm2, %v1634_v8 }
 0x244   : > { %v858_v49 = vadd.f32 %v857_v48, %v527_v35  ;;  %1585 = vmatprep.subr.bf16.mxu1 %v1631_v4 }
 0x246   : > { %v859_v50 = vsel %vm690_vm4, %v858_v49, inf }
 0x247   : > { %860 = vmin.xlane.f32.xlu0 %v859_v50 }
 0x2d4   : > { %v861_v59 = vpop.xlane.xlu0 %860 }
 0x2d5   : > { %vm862_vm7 = vcmp.le.f32.partialorder %v858_v49, %v861_v59 }
 0x2d6   : > { %v863_v60 = vsel %vm862_vm7, %v1748_v42, 16.0 }
 0x2d7   : > { %v864_v61 = vsel %vm690_vm4, %v863_v60, inf }
 0x2d8   : > { %865 = vmin.xlane.f32.xlu1 %v864_v61 }
 0x315   : > { %v771_v0 = vpop.f32.mrb[2].mxu1 }
 0x316   : > { %v775_v1 = vadd.f32 %v771_v0, %v1785_v63  ;;  %v1503_v2 = vpop.f32.mrb[3].mxu1 }
 0x318   : > { %v776_v3 = vmax.f32 %v775_v1, 0.0 }
 0x31a   : > { %1513 = vmatmul.mubr.msk.f32.vlgmr.msra.gmra.mrb[4].mxu0 %vm783_vm8, %v776_v3 }
 0x31b   : > { %1593 = vmatpush3.bf16.msra.mxu0 %v1744_v40  ;;  %1537 = vmatprep.mubr.msk.f32.mxu0 %vm1633_vm2, %v1634_v8 }
 0x31c   : > { %1594 = vmatprep.subr.bf16.mxu0 %v1631_v4 }
 0x365   : > { %v866_v5 = vpop.xlane.xlu1 %865 }
 0x366   : > { %vm867_vm9 = vcmp.eq.f32.partialorder %v1748_v42, %v866_v5 }
 0x367   : > { %v1429_v6 = vsel %vm867_vm9, 1.0, %v1634_v8 }
 0x368   : > { %v1019_v7 = vmul.f32 1e+09, %v1429_v6  ;;  %1520 = vmatmul.mubr.msk.f32.vlgmr.msra.gmra.mrb[4].mxu1 %vm690_vm4, %v1429_v6 }
 0x369   : > { %1587 = vmatpush3.bf16.msra.mxu1 %v1766_v54  ;;  %1530 = vmatprep.mubr.msk.f32.mxu1 %vm1633_vm2, %v1634_v8 }
 0x36a   : > { %v1020_v9 = vadd.f32 %v1019_v7, %v858_v49  ;;  %1588 = vmatprep.subr.bf16.mxu1 %v1631_v4 }
 0x36c   : > { %v1021_v10 = vsel %vm690_vm4, %v1020_v9, inf }
 0x36d   : > { %1022 = vmin.xlane.f32.xlu0 %v1021_v10  ;;  %1590 = vmatpush3.bf16.msra.mxu1 %v1776_v58 }
 0x36e   : > { %1600 = vmatprep.subr.bf16.mxu1 %v1631_v4 }
 0x3ed   : > { %v853_v11 = vpop.f32.mrb[4].mxu0 }
 0x3ee   : > { %v1514_v12 = vpop.f32.mrb[5].mxu0  ;;  %v854_v27 = vadd.f32 %v1427_v25, %v853_v11 }
 0x3fa   : > { %v1023_v13 = vpop.xlane.xlu0 %1022 }
 0x3fb   : > { %vm1024_vm10 = vcmp.le.f32.partialorder %v1020_v9, %v1023_v13 }
 0x3fc   : > { %v1025_v14 = vsel %vm1024_vm10, %v1748_v42, 16.0 }
 0x3fd   : > { %v1026_v15 = vsel %vm690_vm4, %v1025_v14, inf }
 0x3fe   : > { %1027 = vmin.xlane.f32.xlu1 %v1026_v15 }
 0x43b   : > { %v939_v16 = vpop.f32.mrb[4].mxu1 }
 0x43c   : > { %v943_v17 = vadd.f32 %v939_v16, %v1785_v63  ;;  %v1521_v18 = vpop.f32.mrb[5].mxu1 }
 0x43e   : > { %v944_v19 = vmax.f32 %v943_v17, 0.0 }
 0x440   : > { %1531 = vmatmul.mubr.msk.f32.vlgmr.msra.gmra.mrb[6].mxu1 %vm783_vm8, %v944_v19 }
 0x441   : > { %1602 = vmatpush3.bf16.msra.mxu1 %v1744_v40  ;;  %1555 = vmatprep.mubr.msk.f32.mxu1 %vm1633_vm2, %v1634_v8 }
 0x442   : > { %1603 = vmatprep.subr.bf16.mxu1 %v1631_v4 }
 0x48b   : > { %v1028_v20 = vpop.xlane.xlu1 %1027 }
 0x48c   : > { %vm1029_vm11 = vcmp.eq.f32.partialorder %v1748_v42, %v1028_v20 }
 0x48d   : > { %v1432_v21 = vsel %vm1029_vm11, 1.0, %v1634_v8 }
 0x48e   : > { %v1181_v22 = vmul.f32 1e+09, %v1432_v21  ;;  %1538 = vmatmul.mubr.msk.f32.vlgmr.msra.gmra.mrb[6].mxu0 %vm690_vm4, %v1432_v21 }
 0x48f   : > { %1596 = vmatpush3.bf16.msra.mxu0 %v1766_v54  ;;  %1548 = vmatprep.mubr.msk.f32.mxu0 %vm1633_vm2, %v1634_v8 }
 0x490   : > { %v1182_v23 = vadd.f32 %v1181_v22, %v1020_v9  ;;  %1597 = vmatprep.subr.bf16.mxu0 %v1631_v4 }
 0x492   : > { %v1183_v24 = vsel %vm690_vm4, %v1182_v23, inf }
 0x493   : > { %1184 = vmin.xlane.f32.xlu0 %v1183_v24  ;;  %1599 = vmatpush3.bf16.msra.mxu0 %v1776_v58 }
 0x513   : > { %v1014_v26 = vpop.f32.mrb[6].mxu1 }
 0x514   : > { %v1015_v28 = vadd.f32 %v1427_v25, %v1014_v26  ;;  %v1532_v29 = vpop.f32.mrb[7].mxu1 }
 0x516   : > { %v1018_v30 = vmax.f32 %v854_v27, %v1015_v28 }
 0x520   : > { %v1185_v31 = vpop.xlane.xlu0 %1184 }
 0x521   : > { %vm1186_vm12 = vcmp.le.f32.partialorder %v1182_v23, %v1185_v31 }
 0x522   : > { %v1187_v32 = vsel %vm1186_vm12, %v1748_v42, 16.0 }
 0x523   : > { %v1188_v33 = vsel %vm690_vm4, %v1187_v32, inf }
 0x524   : > { %1189 = vmin.xlane.f32.xlu1 %v1188_v33 }
 0x561   : > { %v1101_v34 = vpop.f32.mrb[6].mxu0 }
 0x562   : > { %v1105_v35 = vadd.f32 %v1101_v34, %v1785_v63  ;;  %v1539_v36 = vpop.f32.mrb[7].mxu0 }
 0x564   : > { %v1106_v37 = vmax.f32 %v1105_v35, 0.0 }
 0x566   : > { %1549 = vmatmul.mubr.msk.f32.vlgmr.msra.gmra.mrb[8].mxu0 %vm783_vm8, %v1106_v37 }
 0x5b1   : > { %v1190_v38 = vpop.xlane.xlu1 %1189 }
 0x5b2   : > { %vm1191_vm13 = vcmp.eq.f32.partialorder %v1748_v42, %v1190_v38 }
 0x5b3   : > { %v1435_v39 = vsel %vm1191_vm13, 1.0, %v1634_v8 }
 0x5b4   : > { %1556 = vmatmul.mubr.msk.f32.vlgmr.msra.gmra.mrb[8].mxu1 %vm690_vm4, %v1435_v39 }
 0x5b5   : > { %1605 = vmatpush3.bf16.msra.mxu1 %v1766_v54  ;;  %1566 = vmatprep.mubr.msk.f32.mxu1 %vm1633_vm2, %v1634_v8 }
 0x5b6   : > { %1606 = vmatprep.subr.bf16.mxu1 %v1631_v4 }
 0x5b9   : > { %1608 = vmatpush3.bf16.msra.mxu1 %v1776_v58 }
 0x639   : > { %v1176_v40 = vpop.f32.mrb[8].mxu0 }
 0x63a   : > { %v1177_v41 = vadd.f32 %v1427_v25, %v1176_v40  ;;  %v1550_v43 = vpop.f32.mrb[9].mxu0 }
 0x63c   : > { %v1180_v44 = vmax.f32 %v1018_v30, %v1177_v41 }
 0x687   : > { %v1263_v45 = vpop.f32.mrb[8].mxu1 }
 0x688   : > { %v1267_v42 = vadd.f32 %v1263_v45, %v1785_v63  ;;  %v1557_v46 = vpop.f32.mrb[9].mxu1 }
 0x68a   : > { %v1268_v47 = vmax.f32 %v1267_v42, 0.0 }
 0x68c   : > { %1567 = vmatmul.mubr.msk.f32.vlgmr.msra.gmra.mrb[10].mxu1 %vm783_vm8, %v1268_v47 }
 0x75f   : > { %v1338_v48 = vpop.f32.mrb[10].mxu1 }
 0x760   : > { %v1339_v49 = vadd.f32 %v1427_v25, %v1338_v48  ;;  %v1568_v50 = vpop.f32.mrb[11].mxu1 }
 0x762   : > { %v1342_v4 = vmax.f32 %v1180_v44, %v1339_v49 }
 0x764   : > { %1343 = vst.msk [vmem:[%s344_s25] sm:$0xff] %vm783_vm8, %v1342_v4 }
 0x765 PF: > { %s19_s30 = sadd.s32 1, %s1629_s30  }
 0x766   : > { %p16_p4 = scmp.ge.s32.totalorder %s19_s30, 4  }
 0x768   :  { %18 = sbr.rel (!%p16_p4) target bundleno = 1 (0x1), region = 89 }

// kernel: dgcnn_forward.5
= control target key start
LH: loop header
LB: loop body
LE: loop exit
PB: predicated region body
PF: predicated region fallthrough
CT: control target
= control target key end

     0   :  { %s1722_s30 = smov 0   ;;  %s1907_s0 = inlined_call_operand.vmem [shape: f32[16,32], index: 0, kind: input, shape index: {}, may-alias: {0,1}]   ;;  %s1908_s1 = inlined_call_operand.vmem [shape: f32[16,32], index: 1, kind: input, shape index: {}, may-alias: {0,1}]   ;;  %s1909_s2 = inlined_call_operand.vmem [shape: f32[16,1], index: 2, kind: input, shape index: {}, may-alias: {2,3}]   ;;  %s1910_s3 = inlined_call_operand.vmem [shape: f32[16,1], index: 3, kind: input, shape index: {}, may-alias: {2,3}]   ;;  %s1911_s4 = inlined_call_operand.vmem [shape: f32[32,32], index: 4, kind: input, shape index: {}]   ;;  %s1912_s5 = inlined_call_operand.vmem [shape: f32[32,32], index: 5, kind: input, shape index: {}]   ;;  %s1913_s6 = inlined_call_operand.vmem [shape: f32[1,32], index: 6, kind: input, shape index: {}]   ;;  %s1914_s7 = inlined_call_operand.vmem [shape: f32[32,32], index: 7, kind: input, shape index: {}]   ;;  %s1915_s8 = inlined_call_operand.vmem [shape: f32[1,32], index: 8, kind: input, shape index: {}]   ;;  %s1916_s9 = inlined_call_operand.vmem [shape: f32[16,32], index: 9, kind: output, shape index: {}]  }
   0x1 LB: > { %s1414_s10 = sadd.s32 4294967295, %s1666_s30   ;;  %p1418_p0 = scmp.ge.s32.totalorder %s1666_s30, 1  ;;  %s1666_s30 = sphi %s1722_s30, %s19_s30  }
   0x2   : > { %p295_p1 = scmp.lt.s32.totalorder %s1666_s30, 3 }
   0x4   : > { %p296_p2 = pnand %p1418_p0, %p295_p1 }
   0x5   : > { %v346_v0 = vld [vmem:[%s1908_s1] sm:$0xff] (!%p296_p2)  ;;  %vm352_vm0 = vcmask (!%p296_p2), 261120   ;;  %v347_v1 = vld [vmem:[%s1908_s1 + $0x8] sm:$0xff] (!%p296_p2)  ;;  %p333_p3 = scmp.lt.s32.totalorder (!%p296_p2), %s1414_s10, 1  ;;  %v1668_v4 = vmov (!%p296_p2), 0.0|0.0   ;;  %v1669_v6 = vmov (!%p296_p2), 0   ;;  %v396_v27 = vlaneseq (!%p296_p2) }
   0x6   : > { %299 = sbr.rel (%p296_p2) target bundleno = 1893 (0x765), region = 56  ;;  %v356_v2 = vmul.f32 (!%p296_p2), %v346_v0, %v346_v0  ;;  %v357_v3 = vmul.f32 (!%p296_p2), %v347_v1, %v347_v1  ;;  %1592 = vmatprep.subr.bf16.mxu0 (!%p296_p2), %v1668_v4  ;;  %v1593_v5 = vpack.c.bf16 (!%p296_p2), %v347_v1, %v346_v0  ;;  %vm1594_vm1 = vmpackc.low (!%p296_p2), %vm352_vm0, %vm352_vm0  ;;  %1658 = vset.pattern.permute.xlu1 (!%p296_p2), %v1669_v6  ;;  %vm1670_vm2 = vmmov (!%p296_p2), 0   ;;  %v349_v14 = vld [vmem:[%s1910_s3] sm:$0xff] (!%p296_p2)  ;;  %v350_v15 = vld [vmem:[%s1910_s3 + $0x8] sm:$0xff] (!%p296_p2) }
   0x7   : > { %1596 = vmatprep.subr.bf16.mxu1 (!%p296_p2), %v1668_v4  ;;  %v1671_v8 = vmov (!%p296_p2), 0.0   ;;  %v609_v18 = vld [vmem:[%s1912_s5] sm:$0xff] (!%p296_p2)  ;;  %v610_v19 = vld [vmem:[%s1912_s5 + $0x8] sm:$0xff] (!%p296_p2)  ;;  %v611_v20 = vld [vmem:[%s1912_s5 + $0x10] sm:$0xff] (!%p296_p2)  ;;  %v397_v29 = vshrl.u32 (!%p296_p2), %v396_v27, 7  ;;  %vm696_vm4 = vcmask (!%p296_p2), 130048  }
   0x8   : > { %v358_v7 = vsel (!%p296_p2), %vm352_vm0, %v356_v2, 0.0  ;;  %1595 = vmatpush3.bf16.xpose.msk.msra.mxu0 (!%p296_p2), %vm1594_vm1, %v1593_v5  ;;  %1495 = vmatprep.mubr.msk.f32.mxu0 (!%p296_p2), %vm1670_vm2, %v1671_v8  ;;  %v361_v9 = vsel (!%p296_p2), %vm352_vm0, %v357_v3, 0.0  ;;  %v1602_v21 = vpack.c.bf16 (!%p296_p2), %v610_v19, %v609_v18  ;;  %v612_v22 = vld [vmem:[%s1912_s5 + $0x18] sm:$0xff] (!%p296_p2)  ;;  %v528_v42 = vld [vmem:[%s1911_s4] sm:$0xff] (!%p296_p2)  ;;  %v529_v43 = vld [vmem:[%s1911_s4 + $0x8] sm:$0xff] (!%p296_p2)  ;;  %v689_v51 = vand.u32 (!%p296_p2), 127, %v396_v27 }
   0x9   : > { %359 = vadd.xlane.f32.xlu0 (!%p296_p2), %v358_v7  ;;  %1506 = vmatprep.mubr.msk.f32.mxu1 (!%p296_p2), %vm1670_vm2, %v1671_v8  ;;  %v1606_v23 = vpack.c.bf16 (!%p296_p2), %v612_v22, %v611_v20  ;;  %v398_v30 = vsub.s32 (!%p296_p2), 0, %v397_v29  ;;  %v530_v44 = vld [vmem:[%s1911_s4 + $0x10] sm:$0xff] (!%p296_p2)  ;;  %v1597_v45 = vpack.c.bf16 (!%p296_p2), %v529_v43, %v528_v42  ;;  %v531_v46 = vld [vmem:[%s1911_s4 + $0x18] sm:$0xff] (!%p296_p2)  ;;  %v691_v62 = vld [vmem:[%s1914_s7] sm:$0xff] (!%p296_p2) }
   0xa   : > { %1603 = vmatprep.subr.bf16.mxu0 (!%p296_p2), %v1602_v21  ;;  %v1600_v47 = vpack.c.bf16 (!%p296_p2), %v531_v46, %v530_v44  ;;  %v1810_v52 = vcvt.s32.f32 (!%p296_p2), %v689_v51  ;;  %v692_v63 = vld [vmem:[%s1914_s7 + $0x8] sm:$0xff] (!%p296_p2)  ;;  %v693_v2 = vld [vmem:[%s1914_s7 + $0x10] sm:$0xff] (!%p296_p2)  ;;  %v694_v3 = vld [vmem:[%s1914_s7 + $0x18] sm:$0xff] (!%p296_p2) }
   0xb   : > { %1598 = vmatpush3.bf16.msra.mxu1 (!%p296_p2), %v1597_v45  ;;  %v1838_v5 = vpack.c.bf16 (!%p296_p2), %v694_v3, %v693_v2 }
   0xc   : > { %1599 = vmatprep.subr.bf16.mxu1 (!%p296_p2), %v1668_v4 }
   0xd   : > { %s1918_s10 = smov (!%p333_p3, %s1414_s10), 1  ;;  %362 = vadd.xlane.f32.xlu0 %v361_v9 }
   0xe   : > { %s1743_s15 = sshll.u32 %s1918_s10, 3 }
   0xf   : > { %s336_s18 = scalar_lea.vmem %s1907_s0, %s1743_s15  ;;  %s340_s21 = scalar_lea.vmem %s1909_s2, %s1743_s15  ;;  %1601 = vmatpush3.bf16.msra.mxu1 %v1600_v47 }
  0x10   : > { %v1752_v10 = vld [vmem:[%s336_s18] sm:$0xff]  ;;  %1610 = vmatprep.subr.bf16.mxu1 %v1668_v4  ;;  %s344_s18 = scalar_lea.vmem %s1916_s9, %s1743_s15 }
  0x11   : > { %v351_v11 = vmul.f32 %v1752_v10, %v1752_v10  ;;  %1496 = vmatmul.mubr.msk.f32.vlgmr.msra.gmra.mrb[0].mxu0 %vm352_vm0, %v1752_v10  ;;  %v348_v13 = vld [vmem:[%s340_s21] sm:$0xff] }
  0x12   : > { %1517 = vmatprep.mubr.msk.f32.mxu0 %vm352_vm0, %v346_v0  ;;  %1605 = vmatpush3.bf16.msra.mxu0 %v1602_v21  ;;  %v1826_v0 = vpack.c.bf16 %v692_v63, %v691_v62 }
  0x13   : > { %v353_v12 = vsel %vm352_vm0, %v351_v11, 0.0  ;;  %1607 = vmatprep.subr.bf16.mxu0 %v1606_v23  ;;  %1507 = vmatmul.mubr.msk.f32.vlgmr.msra.gmra.mrb[0].mxu1 %vm352_vm0, %v1752_v10  ;;  %v1426_v10 = vld [vmem:[%s1913_s6] ss:$0 sm:$0xff] }
  0x14   : > { %354 = vadd.xlane.f32.xlu1 %v353_v12  ;;  %1524 = vmatprep.mubr.msk.f32.mxu1 %vm1670_vm2, %v1671_v8 }
  0x16   : > { %1609 = vmatpush3.bf16.msra.mxu0 %v1606_v23 }
  0x17   : > { %1622 = vmatprep.subr.bf16.mxu0 %v1668_v4 }
  0x19   : > { %1518 = vmatmul.mubr.msk.f32.vlgmr.msra.gmra.mrb[2].mxu0 %vm352_vm0, %v347_v1 }
  0x1a   : > { %1553 = vmatprep.mubr.msk.f32.mxu0 %vm1670_vm2, %v1671_v8  ;;  %1624 = vmatpush3.bf16.msra.mxu0 %v1826_v0 }
  0x1b   : > { %1625 = vmatprep.subr.bf16.mxu0 %v1668_v4 }
  0x1e   : > { %1627 = vmatpush3.bf16.msra.mxu0 %v1838_v5 }
  0x1f   : > { %1637 = vmatprep.subr.bf16.mxu0 %v1668_v4 }
  0x25   : > { %516 = vperm.xlu1 %1658, %v348_v13  }
  0x4e   : > { %482 = vxpose.xlu1.b32.start [1/2] (short) (narrow) %v349_v14, 8 }
  0x52   : > { %483 = vxpose.xlu1.b32.end [2/2] (short) (narrow) %v350_v15, 8 }
  0x96   : > { %v360_v16 = vpop.xlane.xlu0 %359 }
  0x97   : > { %364 = vxpose.xlu0.b32.start [1/2] (short) (narrow) %v360_v16, 8 }
  0x9a   : > { %v363_v17 = vpop.xlane.xlu0 %362 }
  0x9b   : > { %365 = vxpose.xlu0.b32.end [2/2] (short) (narrow) %v363_v17, 8 }
  0xa1   : > { %v355_v26 = vpop.xlane.xlu1 %354 }
  0xa5   : > { %v517_v28 = vpop.permute.xlu1 %516 }
  0xc4   : > { %1659 = vset.pattern.permute.xlu0 %v1669_v6 }
  0xce   : > { %v498_v31 = vpop.trf.xlu1 }
  0xcf   : > { %v522_v32 = vrot.slane %v498_v31, %v398_v30 }
  0xd1   : > { %vm523_vm3 = vcmp.ne.f32.partialorder %v517_v28, %v522_v32 }
  0xd2   : > { %v1425_v36 = vsel %vm523_vm3, 1.0, %v1671_v8 }
  0xd3   : > { %v526_v38 = vmul.f32 1e+09, %v1425_v36 }
  0xe4   : > { %v476_v24 = vpop.f32.mrb[0].mxu0 }
  0xe5   : > { %v1497_v25 = vpop.f32.mrb[1].mxu0  ;;  %v480_v35 = vmul.f32 2.0, %v476_v24 }
  0xe6   : > { %v605_v61 = vpop.f32.mrb[0].mxu1 }
  0xe7   : > { %v1508_v1 = vpop.f32.mrb[1].mxu1  ;;  %v1849_v11 = vadd.f32 %v1426_v10, %v605_v61 }
  0xec   : > { %v1519_v48 = vpop.f32.mrb[2].mxu0 }
  0xed   : > { %v679_v49 = vpop.f32.mrb[3].mxu0 }
  0xee   : > { %v1806_v50 = vpack.c.bf16 %v1519_v48, %v679_v49 }
  0xf0   : > { %1612 = vmatpush3.bf16.msra.mxu1 %v1806_v50 }
  0xf1   : > { %1613 = vmatprep.subr.bf16.mxu1 %v1668_v4 }
 0x117   : > { %v380_v33 = vpop.trf.xlu0 }
 0x118   : > { %v399_v34 = vrot.slane %v380_v33, %v398_v30 }
 0x11a   : > { %v400_v37 = vadd.f32 %v399_v34, %v355_v26 }
 0x11c   : > { %v481_v39 = vsub.f32 %v400_v37, %v480_v35  ;;  %v1432_v35 = vld [vmem:[%s1915_s8] ss:$0 sm:$0xff] }
 0x11e   : > { %v527_v40 = vadd.f32 %v526_v38, %v481_v39 }
 0x120   : > { %v697_v41 = vsel %vm696_vm4, %v527_v40, inf }
 0x121   : > { %698 = vmin.xlane.f32.xlu0 %v697_v41 }
 0x1ae   : > { %v699_v53 = vpop.xlane.xlu0 %698 }
 0x1af   : > { %vm700_vm5 = vcmp.le.f32.partialorder %v527_v40, %v699_v53 }
 0x1b0   : > { %v701_v54 = vsel %vm700_vm5, %v1810_v52, 16.0 }
 0x1b1   : > { %v702_v55 = vsel %vm696_vm4, %v701_v54, inf }
 0x1b2   : > { %703 = vmin.xlane.f32.xlu1 %v702_v55 }
 0x23f   : > { %v704_v56 = vpop.xlane.xlu1 %703 }
 0x240   : > { %vm705_vm6 = vcmp.eq.f32.partialorder %v1810_v52, %v704_v56 }
 0x241   : > { %v1430_v57 = vsel %vm705_vm6, 1.0, %v1671_v8 }
 0x242   : > { %v862_v58 = vmul.f32 1e+09, %v1430_v57  ;;  %1525 = vmatmul.mubr.msk.f32.vlgmr.msra.gmra.mrb[2].mxu1 %vm696_vm4, %v1430_v57 }
 0x243   : > { %1535 = vmatprep.mubr.msk.f32.mxu1 %vm1670_vm2, %v1671_v8  ;;  %1615 = vmatpush3.bf16.msra.mxu1 %v1826_v0 }
 0x244   : > { %v863_v59 = vadd.f32 %v862_v58, %v527_v40  ;;  %1616 = vmatprep.subr.bf16.mxu1 %v1668_v4 }
 0x246   : > { %v864_v60 = vsel %vm696_vm4, %v863_v59, inf }
 0x247   : > { %865 = vmin.xlane.f32.xlu0 %v864_v60  ;;  %1618 = vmatpush3.bf16.msra.mxu1 %v1838_v5 }
 0x248   : > { %1619 = vmatprep.subr.bf16.mxu1 %v1668_v4 }
 0x2d4   : > { %v866_v6 = vpop.xlane.xlu0 %865 }
 0x2d5   : > { %vm867_vm7 = vcmp.le.f32.partialorder %v863_v59, %v866_v6 }
 0x2d6   : > { %v868_v7 = vsel %vm867_vm7, %v1810_v52, 16.0 }
 0x2d7   : > { %v869_v9 = vsel %vm696_vm4, %v868_v7, inf }
 0x2d8   : > { %870 = vmin.xlane.f32.xlu1 %v869_v9 }
 0x315   : > { %v777_v12 = vpop.f32.mrb[2].mxu1 }
 0x316   : > { %v781_v13 = vadd.f32 %v777_v12, %v1849_v11  ;;  %v1526_v14 = vpop.f32.mrb[3].mxu1 }
 0x318   : > { %v782_v15 = vmax.f32 %v781_v13, 0.0 }
 0x31a   : > { %1536 = vmatmul.mubr.msk.f32.vlgmr.msra.gmra.mrb[4].mxu1 %vm352_vm0, %v782_v15 }
 0x31b   : > { %1621 = vmatpush3.bf16.msra.mxu1 %v1806_v50  ;;  %1542 = vmatprep.mubr.msk.f32.mxu1 %vm1670_vm2, %v1671_v8 }
 0x31c   : > { %1628 = vmatprep.subr.bf16.mxu1 %v1668_v4 }
 0x365   : > { %v871_v16 = vpop.xlane.xlu1 %870 }
 0x366   : > { %vm872_vm8 = vcmp.eq.f32.partialorder %v1810_v52, %v871_v16 }
 0x367   : > { %v1434_v17 = vsel %vm872_vm8, 1.0, %v1671_v8 }
 0x368   : > { %v1024_v18 = vmul.f32 1e+09, %v1434_v17  ;;  %1543 = vmatmul.mubr.msk.f32.vlgmr.msra.gmra.mrb[6].mxu1 %vm696_vm4, %v1434_v17 }
 0x369   : > { %1630 = vmatpush3.bf16.msra.mxu1 %v1806_v50  ;;  %1560 = vmatprep.mubr.msk.f32.mxu1 %vm1670_vm2, %v1671_v8 }
 0x36a   : > { %v1025_v19 = vadd.f32 %v1024_v18, %v863_v59  ;;  %1631 = vmatprep.subr.bf16.mxu1 %v1668_v4 }
 0x36c   : > { %v1026_v20 = vsel %vm696_vm4, %v1025_v19, inf }
 0x36d   : > { %1027 = vmin.xlane.f32.xlu0 %v1026_v20 }
 0x3ed   : > { %v858_v21 = vpop.f32.mrb[4].mxu1 }
 0x3ee   : > { %v1537_v22 = vpop.f32.mrb[5].mxu1  ;;  %v859_v37 = vadd.f32 %v1432_v35, %v858_v21 }
 0x3fa   : > { %v1028_v23 = vpop.xlane.xlu0 %1027 }
 0x3fb   : > { %vm1029_vm9 = vcmp.le.f32.partialorder %v1025_v19, %v1028_v23 }
 0x3fc   : > { %v1030_v24 = vsel %vm1029_vm9, %v1810_v52, 16.0 }
 0x3fd   : > { %v1031_v25 = vsel %vm696_vm4, %v1030_v24, inf }
 0x3fe   : > { %1032 = vmin.xlane.f32.xlu1 %v1031_v25 }
 0x43b   : > { %v944_v26 = vpop.f32.mrb[6].mxu1 }
 0x43c   : > { %v948_v27 = vadd.f32 %v944_v26, %v1849_v11  ;;  %v1544_v28 = vpop.f32.mrb[7].mxu1 }
 0x43e   : > { %v949_v29 = vmax.f32 %v948_v27, 0.0 }
 0x440   : > { %1554 = vmatmul.mubr.msk.f32.vlgmr.msra.gmra.mrb[4].mxu0 %vm352_vm0, %v949_v29 }
 0x441   : > { %1639 = vmatpush3.bf16.msra.mxu0 %v1806_v50  ;;  %1578 = vmatprep.mubr.msk.f32.mxu0 %vm1670_vm2, %v1671_v8 }
 0x442   : > { %1640 = vmatprep.subr.bf16.mxu0 %v1668_v4 }
 0x48b   : > { %v1033_v30 = vpop.xlane.xlu1 %1032 }
 0x48c   : > { %vm1034_vm10 = vcmp.eq.f32.partialorder %v1810_v52, %v1033_v30 }
 0x48d   : > { %v1437_v31 = vsel %vm1034_vm10, 1.0, %v1671_v8 }
 0x48e   : > { %v1186_v32 = vmul.f32 1e+09, %v1437_v31  ;;  %1561 = vmatmul.mubr.msk.f32.vlgmr.msra.gmra.mrb[8].mxu1 %vm696_vm4, %v1437_v31 }
 0x48f   : > { %1633 = vmatpush3.bf16.msra.mxu1 %v1826_v0  ;;  %1571 = vmatprep.mubr.msk.f32.mxu1 %vm1670_vm2, %v1671_v8 }
 0x490   : > { %v1187_v33 = vadd.f32 %v1186_v32, %v1025_v19  ;;  %1634 = vmatprep.subr.bf16.mxu1 %v1668_v4 }
 0x492   : > { %v1188_v34 = vsel %vm696_vm4, %v1187_v33, inf }
 0x493   : > { %1189 = vmin.xlane.f32.xlu0 %v1188_v34  ;;  %1636 = vmatpush3.bf16.msra.mxu1 %v1838_v5 }
 0x513   : > { %v1019_v36 = vpop.f32.mrb[4].mxu0 }
 0x514   : > { %v1020_v38 = vadd.f32 %v1432_v35, %v1019_v36  ;;  %v1555_v39 = vpop.f32.mrb[5].mxu0 }
 0x516   : > { %v1023_v40 = vmax.f32 %v859_v37, %v1020_v38 }
 0x520   : > { %v1190_v41 = vpop.xlane.xlu0 %1189 }
 0x521   : > { %vm1191_vm11 = vcmp.le.f32.partialorder %v1187_v33, %v1190_v41 }
 0x522   : > { %v1192_v42 = vsel %vm1191_vm11, %v1810_v52, 16.0 }
 0x523   : > { %v1193_v43 = vsel %vm696_vm4, %v1192_v42, inf }
 0x524   : > { %1194 = vmin.xlane.f32.xlu1 %v1193_v43 }
 0x561   : > { %v1106_v44 = vpop.f32.mrb[8].mxu1 }
 0x562   : > { %v1110_v45 = vadd.f32 %v1106_v44, %v1849_v11  ;;  %v1562_v46 = vpop.f32.mrb[9].mxu1 }
 0x564   : > { %v1111_v47 = vmax.f32 %v1110_v45, 0.0 }
 0x566   : > { %1572 = vmatmul.mubr.msk.f32.vlgmr.msra.gmra.mrb[10].mxu1 %vm352_vm0, %v1111_v47 }
 0x5b1   : > { %v1195_v48 = vpop.xlane.xlu1 %1194 }
 0x5b2   : > { %vm1196_vm12 = vcmp.eq.f32.partialorder %v1810_v52, %v1195_v48 }
 0x5b3   : > { %v1440_v49 = vsel %vm1196_vm12, 1.0, %v1671_v8 }
 0x5b4   : > { %1579 = vmatmul.mubr.msk.f32.vlgmr.msra.gmra.mrb[6].mxu0 %vm696_vm4, %v1440_v49 }
 0x5b5   : > { %1642 = vmatpush3.bf16.msra.mxu0 %v1826_v0  ;;  %1589 = vmatprep.mubr.msk.f32.mxu0 %vm1670_vm2, %v1671_v8 }
 0x5b6   : > { %1643 = vmatprep.subr.bf16.mxu0 %v1668_v4 }
 0x5b9   : > { %1645 = vmatpush3.bf16.msra.mxu0 %v1838_v5 }
 0x639   : > { %v1181_v50 = vpop.f32.mrb[10].mxu1 }
 0x63a   : > { %v1182_v51 = vadd.f32 %v1432_v35, %v1181_v50  ;;  %v1573_v53 = vpop.f32.mrb[11].mxu1 }
 0x63c   : > { %v1185_v54 = vmax.f32 %v1023_v40, %v1182_v51 }
 0x687   : > { %v1268_v55 = vpop.f32.mrb[6].mxu0 }
 0x688   : > { %v1272_v52 = vadd.f32 %v1268_v55, %v1849_v11  ;;  %v1580_v56 = vpop.f32.mrb[7].mxu0 }
 0x68a   : > { %v1273_v57 = vmax.f32 %v1272_v52, 0.0 }
 0x68c   : > { %1590 = vmatmul.mubr.msk.f32.vlgmr.msra.gmra.mrb[8].mxu0 %vm352_vm0, %v1273_v57 }
 0x75f   : > { %v1343_v58 = vpop.f32.mrb[8].mxu0 }
 0x760   : > { %v1344_v59 = vadd.f32 %v1432_v35, %v1343_v58  ;;  %v1591_v60 = vpop.f32.mrb[9].mxu0 }
 0x762   : > { %v1347_v4 = vmax.f32 %v1185_v54, %v1344_v59 }
 0x764   : > { %1348 = vst.msk [vmem:[%s344_s18] sm:$0xff] %vm352_vm0, %v1347_v4 }
 0x765 PF: > { %s19_s30 = sadd.s32 1, %s1666_s30  }
 0x766   : > { %p16_p4 = scmp.ge.s32.totalorder %s19_s30, 4  }
 0x768   :  { %18 = sbr.rel (!%p16_p4) target bundleno = 1 (0x1), region = 89 }

</bundles_post_ra>
